<compile_context>
chip_gen: v6e
topology: v6e:2x2x1
jax: 0.10.0
libtpu: 0.0.40
codegen_flags: <defaults>
</compile_context>

<pallas_src>
import functools

import jax
import jax.numpy as jnp
from jax.experimental import pallas as pl
from jax.experimental.pallas import tpu as pltpu

_LANE = 128


def _round_up(x, m):
    return (x + m - 1) // m * m


def _cdiv(a, b):
    return (a + b - 1) // b


def _softplus(x):
    # numerically stable softplus in f32: log(1 + exp(x))
    return jnp.logaddexp(x, 0.0)


def _vmem_capacity_bytes():
    try:
        return int(pltpu.get_tpu_info().vmem_capacity_bytes)
    except Exception:
        return 64 << 20  # conservative (v7x-class) fallback


def _adaptive_dist_kernel(h_ref, eps_ref, wp_ref, bp_ref, wh_ref, bh_ref,
                          out_ref, *, k_pad, d_pad):
    """One M-tile of the fused forward pass.

    h_ref   : (TM, 2D)              bf16  input features
    eps_ref : (TM, D_pad)           bf16  standard-normal noise (zero-padded)
    wp_ref  : (2D, D_pad)           bf16  projection weight (resident)
    bp_ref  : (1, D_pad)            f32   projection bias   (resident)
    wh_ref  : (D_pad, 4K_pad+2D_pad) bf16 fused head weights [w|loc|scale|df|z_mu|z_sig]
    bh_ref  : (1, 4K_pad+2D_pad)    f32   fused head biases (softmax pads = -1e30)
    out_ref : (TM, 4K_pad+D_pad)    f32   lane-dense slab [weights|locs|scales|dfs|z]
    """
    h = h_ref[...]                                            # (TM, 2D) bf16

    # h_t = dropout(projection(h_t))  -- dropout == identity (eval semantics)
    proj = jnp.dot(h, wp_ref[...], preferred_element_type=jnp.float32)
    proj = proj + bp_ref[...]                                 # (TM, D_pad) f32

    # Single fused GEMM for all five heads (bf16 operands, f32 accumulate).
    head = jnp.dot(proj.astype(jnp.bfloat16), wh_ref[...],
                   preferred_element_type=jnp.float32)
    head = head + bh_ref[...]                                 # (TM, 4Kp+2Dp) f32

    # All section boundaries are multiples of 128 lanes -> copy-free slices.
    logits      = head[:, 0:k_pad]
    locs        = head[:, k_pad:2 * k_pad]
    scales_raw  = head[:, 2 * k_pad:3 * k_pad]
    dfs_raw     = head[:, 3 * k_pad:4 * k_pad]
    z_mu        = head[:, 4 * k_pad:4 * k_pad + d_pad]
    z_sigma_raw = head[:, 4 * k_pad + d_pad:4 * k_pad + 2 * d_pad]

    # softmax over the full aligned lane block; pad lanes carry bias -1e30 so
    # exp == 0 there (no masking needed).  Exact divide -> exact simplex rows.
    mx = jnp.max(logits, axis=-1, keepdims=True)
    e = jnp.exp(logits - mx)
    weights = e / jnp.sum(e, axis=-1, keepdims=True)

    scales = _softplus(scales_raw)                            # softplus(scale_net)
    dfs = _softplus(dfs_raw) + 2.0                            # softplus(df_net) + 2
    z = z_mu + _softplus(z_sigma_raw) * eps_ref[...].astype(jnp.float32)

    # Full-width, 128-aligned section stores into the lane-dense output slab:
    # every store is an unmasked vst; no tail fill (slab width == 4Kp + Dp).
    out_ref[:, 0:k_pad]                     = weights
    out_ref[:, k_pad:2 * k_pad]             = locs
    out_ref[:, 2 * k_pad:3 * k_pad]         = scales
    out_ref[:, 3 * k_pad:4 * k_pad]         = dfs
    out_ref[:, 4 * k_pad:4 * k_pad + d_pad] = z


def prepare_params(params):
    """One-time fusion / lane-padding / bf16 cast of all weights.

    Hoisted out of the forward path so each call pays zero weight reshuffling.
    """
    d_model = params["wp"].shape[-1]
    two_d = params["wp"].shape[0]
    k = params["ww"].shape[-1]
    k_pad = _round_up(k, _LANE)
    d_pad = _round_up(d_model, _LANE)

    def pad_cols(w, b, width, bias_pad=0.0):
        w = jnp.pad(w, ((0, 0), (0, width - w.shape[-1])))
        b = jnp.pad(b, ((0, 0), (0, width - b.shape[-1])),
                    constant_values=bias_pad)
        return w, b

    # weight_net pad-lane biases = -1e30 -> softmax gives them exactly 0 prob.
    ww, bw = pad_cols(params["ww"], params["bw"], k_pad, bias_pad=-1e30)
    wl, bl = pad_cols(params["wl"], params["bl"], k_pad)
    ws, bs = pad_cols(params["ws"], params["bs"], k_pad)
    wd, bd = pad_cols(params["wd"], params["bd"], k_pad)

    # z_net: split [mu | sigma] halves (== torch.chunk order), pad each to D_pad.
    wz_mu, wz_sig = params["wz"][:, :d_model], params["wz"][:, d_model:]
    bz_mu, bz_sig = params["bz"][:, :d_model], params["bz"][:, d_model:]
    wz_mu, bz_mu = pad_cols(wz_mu, bz_mu, d_pad)
    wz_sig, bz_sig = pad_cols(wz_sig, bz_sig, d_pad)

    w_heads = jnp.concatenate([ww, wl, ws, wd, wz_mu, wz_sig], axis=1)
    b_heads = jnp.concatenate([bw, bl, bs, bd, bz_mu, bz_sig], axis=1)
    # pad head-GEMM contraction dim D -> D_pad with zero rows
    w_heads = jnp.pad(w_heads, ((0, d_pad - d_model), (0, 0)))

    # projection: pad output columns D -> D_pad (zero weight / zero bias)
    wp = jnp.pad(params["wp"], ((0, 0), (0, d_pad - d_model)))
    bp = jnp.pad(params["bp"], ((0, 0), (0, d_pad - d_model)))

    return dict(
        wp=wp.astype(jnp.bfloat16), bp=bp.astype(jnp.float32),
        wh=w_heads.astype(jnp.bfloat16), bh=b_heads.astype(jnp.float32),
        k=k, d_model=d_model, two_d=two_d, k_pad=k_pad, d_pad=d_pad)


def adaptive_distribution_forward(h_t, fused, eps, *, tm=None):
    """h_t: (B,S,2D) f32, eps: (B,S,D) f32 noise.

    Returns (weights, locs, scales, dfs, z)."""
    batch, seq, two_d = h_t.shape
    assert two_d == fused["two_d"]
    d_model, k = fused["d_model"], fused["k"]
    k_pad, d_pad = fused["k_pad"], fused["d_pad"]
    m = batch * seq

    # Per-generation tiling: 128-MiB-VMEM chips (v5e/v6e) -> TM=1024, ~100 MiB;
    # 64-MiB chips (v7x-class) -> TM=512, 48 MiB cap.
    big_vmem = _vmem_capacity_bytes() >= (100 << 20)
    if tm is None:
        tm = 1024 if big_vmem else 512
    vmem_limit = (100 << 20) if big_vmem else (48 << 20)

    # Row tiling: multiples of 16 (bf16 sublane packing).  Force >=2 grid steps
    # when there is enough work so ("parallel",) can shard M across both TCs.
    tm_eff = min(tm, _round_up(m, 16))
    if m >= 64 and _cdiv(m, tm_eff) < 2:
        tm_eff = _round_up(_cdiv(m, 2), 16)
    m_pad = _round_up(m, tm_eff)
    grid = (m_pad // tm_eff,)

    # Streaming operands in bf16 (under jit these casts fuse with the producer).
    h_flat = h_t.reshape(m, two_d).astype(jnp.bfloat16)
    eps_flat = eps.reshape(m, d_model).astype(jnp.bfloat16)
    h_flat = jnp.pad(h_flat, ((0, m_pad - m), (0, 0)))
    eps_flat = jnp.pad(eps_flat, ((0, m_pad - m), (0, d_pad - d_model)))

    out_w = 4 * k_pad + d_pad          # lane-dense output slab (multiple of 128)
    h_cols = 4 * k_pad + 2 * d_pad     # fused head GEMM width (multiple of 256)
    kernel = functools.partial(_adaptive_dist_kernel, k_pad=k_pad, d_pad=d_pad)

    def run(resident_mode):
        extra = {} if resident_mode is None else {"pipeline_mode": resident_mode}
        grid_spec = pltpu.PrefetchScalarGridSpec(
            num_scalar_prefetch=0,
            grid=grid,
            in_specs=[
                pl.BlockSpec((tm_eff, two_d), lambda i: (i, 0)),           # h tile
                pl.BlockSpec((tm_eff, d_pad), lambda i: (i, 0)),           # eps tile
                pl.BlockSpec((two_d, d_pad), lambda i: (0, 0), **extra),   # wp (resident)
                pl.BlockSpec((1, d_pad), lambda i: (0, 0), **extra),       # bp (resident)
                pl.BlockSpec((d_pad, h_cols), lambda i: (0, 0), **extra),  # fused head W
                pl.BlockSpec((1, h_cols), lambda i: (0, 0), **extra),      # fused head b
            ],
            out_specs=pl.BlockSpec((tm_eff, out_w), lambda i: (i, 0)),
        )
        return pl.pallas_call(
            kernel,
            out_shape=jax.ShapeDtypeStruct((m_pad, out_w), jnp.float32),
            grid_spec=grid_spec,
            compiler_params=pltpu.CompilerParams(
                dimension_semantics=("parallel",),
                vmem_limit_bytes=vmem_limit),
        )(h_flat, eps_flat, fused["wp"], fused["bp"], fused["wh"], fused["bh"])

    try:
        # Single-buffer the constant-index weight operands (never re-fetched):
        # avoids 2x VMEM residency and frees headroom for bigger TM on v7x.
        slab = run(pl.Buffered(buffer_count=1))
    except Exception:
        # JAX build without BlockSpec(pipeline_mode=...): default buffering.
        slab = run(None)

    slab = slab[:m]
    weights = slab[:, 0:k].reshape(batch, seq, k)
    locs = slab[:, k_pad:k_pad + k].reshape(batch, seq, k)
    scales = slab[:, 2 * k_pad:2 * k_pad + k].reshape(batch, seq, k)
    dfs = slab[:, 3 * k_pad:3 * k_pad + k].reshape(batch, seq, k)
    z = slab[:, 4 * k_pad:4 * k_pad + d_model].reshape(batch, seq, d_model)
    return weights, locs, scales, dfs, z


def init_params(key, d_model, num_components):
    """Deterministic nn.Linear-style init: U(-1/sqrt(fan_in), 1/sqrt(fan_in))."""
    def linear(key, fan_in, fan_out):
        kw, kb = jax.random.split(key)
        bound = 1.0 / jnp.sqrt(fan_in)
        w = jax.random.uniform(kw, (fan_in, fan_out), jnp.float32, -bound, bound)
        b = jax.random.uniform(kb, (1, fan_out), jnp.float32, -bound, bound)
        return w, b

    keys = jax.random.split(key, 6)
    wp, bp = linear(keys[0], d_model * 2, d_model)      # projection
    ww, bw = linear(keys[1], d_model, num_components)   # weight_net
    wl, bl = linear(keys[2], d_model, num_components)   # loc_net
    ws, bs = linear(keys[3], d_model, num_components)   # scale_net
    wd, bd = linear(keys[4], d_model, num_components)   # df_net
    wz, bz = linear(keys[5], d_model, d_model * 2)      # z_net
    return dict(wp=wp, bp=bp, ww=ww, bw=bw, wl=wl, bl=bl,
                ws=ws, bs=bs, wd=wd, bd=bd, wz=wz, bz=bz)


def reference_forward(h_t, params, eps):
    """Pure-JAX f32 reference of the PyTorch module (eval-mode dropout)."""
    d = params["wp"].shape[-1]
    proj = h_t @ params["wp"] + params["bp"]
    weights = jax.nn.softmax(proj @ params["ww"] + params["bw"], axis=-1)
    locs = proj @ params["wl"] + params["bl"]
    scales = jax.nn.softplus(proj @ params["ws"] + params["bs"])
    dfs = jax.nn.softplus(proj @ params["wd"] + params["bd"]) + 2.0
    zp = proj @ params["wz"] + params["bz"]
    z = zp[..., :d] + jax.nn.softplus(zp[..., d:]) * eps
    return weights, locs, scales, dfs, z


if __name__ == "__main__":
    d_model = 32
    num_components = 3
    batch, seq = 2, 8

    root = jax.random.PRNGKey(0)
    k_params, k_input, k_noise = jax.random.split(root, 3)

    params = init_params(k_params, d_model, num_components)
    fused = prepare_params(params)   # one-time fuse / pad / bf16 cast (hoisted)
    h_t = jax.random.normal(k_input, (batch, seq, d_model * 2), jnp.float32)
    eps = jax.random.normal(k_noise, (batch, seq, d_model), jnp.float32)

    outs = adaptive_distribution_forward(h_t, fused, eps)
    weights, locs, scales, dfs, z = jax.block_until_ready(outs)

    assert weights.shape == (batch, seq, num_components)
    assert locs.shape == (batch, seq, num_components)
    assert scales.shape == (batch, seq, num_components)
    assert dfs.shape == (batch, seq, num_components)
    assert z.shape == (batch, seq, d_model)

    # Compare against a pure-JAX f32 reference (bf16 MXU operands -> loose tol).
    ref = reference_forward(h_t, params, eps)
    for name, got, want in zip(("weights", "locs", "scales", "dfs", "z"),
                               (weights, locs, scales, dfs, z), ref):
        err = float(jnp.max(jnp.abs(got - want)))
        assert jnp.allclose(got, want, atol=5e-2, rtol=5e-2), (name, err)

    # Exact softmax divide -> rows sum to 1 within f32 rounding.
    assert jnp.allclose(jnp.sum(weights, axis=-1), 1.0, atol=1e-4)
    assert bool(jnp.all(scales >= 0.0))
    assert bool(jnp.all(dfs >= 2.0))
    assert bool(jnp.all(jnp.isfinite(z)))

    print("KERNEL_OK")
</pallas_src>

<mosaic_0001>
module attributes {stable_mosaic.version = 11 : i64} {
  func.func @_adaptive_dist_kernel(%arg0: i32, %arg1: memref<16x64xbf16, #tpu.memory_space<vmem>>, %arg2: memref<16x128xbf16, #tpu.memory_space<vmem>>, %arg3: memref<64x128xbf16, #tpu.memory_space<vmem>>, %arg4: memref<1x128xf32, #tpu.memory_space<vmem>>, %arg5: memref<128x768xbf16, #tpu.memory_space<vmem>>, %arg6: memref<1x768xf32, #tpu.memory_space<vmem>>, %arg7: memref<16x640xf32, #tpu.memory_space<vmem>>) attributes {dimension_semantics = [#tpu.dimension_semantics<parallel>], iteration_bounds = array<i64: 1>, scalar_prefetch = 0 : i64, scratch_operands = 0 : i64, tpu.core_type = #tpu.core_type<tc>, window_params = [{transform_indices = @transform_0, window_bounds = array<i64: 16, 64>}, {transform_indices = @transform_1, window_bounds = array<i64: 16, 128>}, {pipeline_mode = #tpu.pipeline_mode<synchronous>, transform_indices = @transform_2, window_bounds = array<i64: 64, 128>}, {pipeline_mode = #tpu.pipeline_mode<synchronous>, transform_indices = @transform_3, window_bounds = array<i64: 1, 128>}, {pipeline_mode = #tpu.pipeline_mode<synchronous>, transform_indices = @transform_4, window_bounds = array<i64: 128, 768>}, {pipeline_mode = #tpu.pipeline_mode<synchronous>, transform_indices = @transform_5, window_bounds = array<i64: 1, 768>}, {transform_indices = @transform_6, window_bounds = array<i64: 16, 640>}]} {
    %c0 = arith.constant 0 : index
    %c0_0 = arith.constant 0 : index
    %0 = vector.load %arg1[%c0, %c0_0] : memref<16x64xbf16, #tpu.memory_space<vmem>>, vector<16x64xbf16>
    %c0_1 = arith.constant 0 : index
    %c0_2 = arith.constant 0 : index
    %1 = vector.load %arg3[%c0_1, %c0_2] : memref<64x128xbf16, #tpu.memory_space<vmem>>, vector<64x128xbf16>
    %cst = arith.constant dense<0.000000e+00> : vector<16x128xf32>
    %2 = tpu.matmul %0, %1, %cst {dimension_numbers = #tpu.dot_dimension_numbers<[1], [0], [0], [1], [0, 0, 1, 1], [], []>} : vector<16x64xbf16>, vector<64x128xbf16>, vector<16x128xf32> -> vector<16x128xf32>
    %c0_3 = arith.constant 0 : index
    %c0_4 = arith.constant 0 : index
    %3 = vector.load %arg4[%c0_3, %c0_4] : memref<1x128xf32, #tpu.memory_space<vmem>>, vector<1x128xf32>
    %4 = vector.broadcast %3 : vector<1x128xf32> to vector<16x128xf32>
    %5 = arith.addf %2, %4 : vector<16x128xf32>
    %6 = arith.truncf %5 : vector<16x128xf32> to vector<16x128xbf16>
    %c0_5 = arith.constant 0 : index
    %c0_6 = arith.constant 0 : index
    %7 = vector.load %arg5[%c0_5, %c0_6] : memref<128x768xbf16, #tpu.memory_space<vmem>>, vector<128x768xbf16>
    %cst_7 = arith.constant dense<0.000000e+00> : vector<16x768xf32>
    %8 = tpu.matmul %6, %7, %cst_7 {dimension_numbers = #tpu.dot_dimension_numbers<[1], [0], [0], [1], [0, 0, 1, 1], [], []>} : vector<16x128xbf16>, vector<128x768xbf16>, vector<16x768xf32> -> vector<16x768xf32>
    %c0_8 = arith.constant 0 : index
    %c0_9 = arith.constant 0 : index
    %9 = vector.load %arg6[%c0_8, %c0_9] : memref<1x768xf32, #tpu.memory_space<vmem>>, vector<1x768xf32>
    %10 = vector.broadcast %9 : vector<1x768xf32> to vector<16x768xf32>
    %11 = arith.addf %8, %10 : vector<16x768xf32>
    %12 = vector.extract_strided_slice %11 {offsets = [0, 0], sizes = [16, 128], strides = [1, 1]} : vector<16x768xf32> to vector<16x128xf32>
    %13 = vector.extract_strided_slice %11 {offsets = [0, 128], sizes = [16, 128], strides = [1, 1]} : vector<16x768xf32> to vector<16x128xf32>
    %14 = vector.extract_strided_slice %11 {offsets = [0, 256], sizes = [16, 128], strides = [1, 1]} : vector<16x768xf32> to vector<16x128xf32>
    %15 = vector.extract_strided_slice %11 {offsets = [0, 384], sizes = [16, 128], strides = [1, 1]} : vector<16x768xf32> to vector<16x128xf32>
    %16 = vector.extract_strided_slice %11 {offsets = [0, 512], sizes = [16, 128], strides = [1, 1]} : vector<16x768xf32> to vector<16x128xf32>
    %17 = vector.extract_strided_slice %11 {offsets = [0, 640], sizes = [16, 128], strides = [1, 1]} : vector<16x768xf32> to vector<16x128xf32>
    %cst_10 = arith.constant dense<0xFF800000> : vector<16xf32>
    %18 = vector.multi_reduction <maximumf>, %12, %cst_10 [1] : vector<16x128xf32> to vector<16xf32>
    %19 = vector.shape_cast %18 : vector<16xf32> to vector<16x1xf32>
    %20 = vector.broadcast %19 : vector<16x1xf32> to vector<16x128xf32>
    %21 = arith.subf %12, %20 : vector<16x128xf32>
    %22 = math.exp %21 : vector<16x128xf32>
    %cst_11 = arith.constant dense<0.000000e+00> : vector<16xf32>
    %23 = vector.multi_reduction <add>, %22, %cst_11 [1] : vector<16x128xf32> to vector<16xf32>
    %24 = vector.shape_cast %23 : vector<16xf32> to vector<16x1xf32>
    %25 = vector.broadcast %24 : vector<16x1xf32> to vector<16x128xf32>
    %26 = arith.divf %22, %25 : vector<16x128xf32>
    %cst_12 = arith.constant 0.000000e+00 : f32
    %27 = vector.broadcast %cst_12 : f32 to vector<16x128xf32>
    %28 = arith.maximumf %14, %27 : vector<16x128xf32>
    %29 = vector.broadcast %cst_12 : f32 to vector<16x128xf32>
    %30 = arith.subf %14, %29 : vector<16x128xf32>
    %31 = arith.cmpf one, %30, %30 : vector<16x128xf32>
    %32 = vector.broadcast %cst_12 : f32 to vector<16x128xf32>
    %33 = arith.addf %14, %32 : vector<16x128xf32>
    %34 = math.absf %30 : vector<16x128xf32>
    %cst_13 = arith.constant 0.000000e+00 : f32
    %35 = vector.broadcast %cst_13 : f32 to vector<16x128xf32>
    %36 = arith.subf %35, %34 : vector<16x128xf32>
    %37 = math.exp %36 : vector<16x128xf32>
    %38 = math.log1p %37 : vector<16x128xf32>
    %39 = arith.addf %28, %38 : vector<16x128xf32>
    %40 = arith.select %31, %33, %39 : vector<16x128xi1>, vector<16x128xf32>
    %cst_14 = arith.constant 0.000000e+00 : f32
    %41 = vector.broadcast %cst_14 : f32 to vector<16x128xf32>
    %42 = arith.maximumf %15, %41 : vector<16x128xf32>
    %43 = vector.broadcast %cst_14 : f32 to vector<16x128xf32>
    %44 = arith.subf %15, %43 : vector<16x128xf32>
    %45 = arith.cmpf one, %44, %44 : vector<16x128xf32>
    %46 = vector.broadcast %cst_14 : f32 to vector<16x128xf32>
    %47 = arith.addf %15, %46 : vector<16x128xf32>
    %48 = math.absf %44 : vector<16x128xf32>
    %cst_15 = arith.constant 0.000000e+00 : f32
    %49 = vector.broadcast %cst_15 : f32 to vector<16x128xf32>
    %50 = arith.subf %49, %48 : vector<16x128xf32>
    %51 = math.exp %50 : vector<16x128xf32>
    %52 = math.log1p %51 : vector<16x128xf32>
    %53 = arith.addf %42, %52 : vector<16x128xf32>
    %54 = arith.select %45, %47, %53 : vector<16x128xi1>, vector<16x128xf32>
    %cst_16 = arith.constant 2.000000e+00 : f32
    %55 = vector.broadcast %cst_16 : f32 to vector<16x128xf32>
    %56 = arith.addf %54, %55 : vector<16x128xf32>
    %cst_17 = arith.constant 0.000000e+00 : f32
    %57 = vector.broadcast %cst_17 : f32 to vector<16x128xf32>
    %58 = arith.maximumf %17, %57 : vector<16x128xf32>
    %59 = vector.broadcast %cst_17 : f32 to vector<16x128xf32>
    %60 = arith.subf %17, %59 : vector<16x128xf32>
    %61 = arith.cmpf one, %60, %60 : vector<16x128xf32>
    %62 = vector.broadcast %cst_17 : f32 to vector<16x128xf32>
    %63 = arith.addf %17, %62 : vector<16x128xf32>
    %64 = math.absf %60 : vector<16x128xf32>
    %cst_18 = arith.constant 0.000000e+00 : f32
    %65 = vector.broadcast %cst_18 : f32 to vector<16x128xf32>
    %66 = arith.subf %65, %64 : vector<16x128xf32>
    %67 = math.exp %66 : vector<16x128xf32>
    %68 = math.log1p %67 : vector<16x128xf32>
    %69 = arith.addf %58, %68 : vector<16x128xf32>
    %70 = arith.select %61, %63, %69 : vector<16x128xi1>, vector<16x128xf32>
    %c0_19 = arith.constant 0 : index
    %c0_20 = arith.constant 0 : index
    %71 = vector.load %arg2[%c0_19, %c0_20] : memref<16x128xbf16, #tpu.memory_space<vmem>>, vector<16x128xbf16>
    %72 = arith.extf %71 : vector<16x128xbf16> to vector<16x128xf32>
    %73 = arith.mulf %70, %72 : vector<16x128xf32>
    %74 = arith.addf %16, %73 : vector<16x128xf32>
    %c0_21 = arith.constant 0 : index
    %c0_22 = arith.constant 0 : index
    %75 = vector.load %arg7[%c0_21, %c0_22] : memref<16x640xf32, #tpu.memory_space<vmem>>, vector<16x128xf32>
    tpu.vector_store %arg7[%c0_21, %c0_22], %26 {strides = array<i32>} : memref<16x640xf32, #tpu.memory_space<vmem>>, vector<16x128xf32>,
    %c0_23 = arith.constant 0 : index
    %c128 = arith.constant 128 : index
    %76 = vector.load %arg7[%c0_23, %c128] : memref<16x640xf32, #tpu.memory_space<vmem>>, vector<16x128xf32>
    tpu.vector_store %arg7[%c0_23, %c128], %13 {strides = array<i32>} : memref<16x640xf32, #tpu.memory_space<vmem>>, vector<16x128xf32>,
    %c0_24 = arith.constant 0 : index
    %c256 = arith.constant 256 : index
    %77 = vector.load %arg7[%c0_24, %c256] : memref<16x640xf32, #tpu.memory_space<vmem>>, vector<16x128xf32>
    tpu.vector_store %arg7[%c0_24, %c256], %40 {strides = array<i32>} : memref<16x640xf32, #tpu.memory_space<vmem>>, vector<16x128xf32>,
    %c0_25 = arith.constant 0 : index
    %c384 = arith.constant 384 : index
    %78 = vector.load %arg7[%c0_25, %c384] : memref<16x640xf32, #tpu.memory_space<vmem>>, vector<16x128xf32>
    tpu.vector_store %arg7[%c0_25, %c384], %56 {strides = array<i32>} : memref<16x640xf32, #tpu.memory_space<vmem>>, vector<16x128xf32>,
    %c0_26 = arith.constant 0 : index
    %c512 = arith.constant 512 : index
    %79 = vector.load %arg7[%c0_26, %c512] : memref<16x640xf32, #tpu.memory_space<vmem>>, vector<16x128xf32>
    tpu.vector_store %arg7[%c0_26, %c512], %74 {strides = array<i32>} : memref<16x640xf32, #tpu.memory_space<vmem>>, vector<16x128xf32>,
    return
  }
  func.func @transform_0(%arg0: i32) -> (i32, i32) {
    %c0_i32 = arith.constant 0 : i32
    %c0_i32_0 = arith.constant 0 : i32
    return %arg0, %c0_i32 : i32, i32
  }
  func.func @transform_1(%arg0: i32) -> (i32, i32) {
    %c0_i32 = arith.constant 0 : i32
    %c0_i32_0 = arith.constant 0 : i32
    return %arg0, %c0_i32 : i32, i32
  }
  func.func @transform_2(%arg0: i32) -> (i32, i32) {
    %c0_i32 = arith.constant 0 : i32
    %c0_i32_0 = arith.constant 0 : i32
    %c0_i32_1 = arith.constant 0 : i32
    return %c0_i32, %c0_i32_0 : i32, i32
  }
  func.func @transform_3(%arg0: i32) -> (i32, i32) {
    %c0_i32 = arith.constant 0 : i32
    %c0_i32_0 = arith.constant 0 : i32
    %c0_i32_1 = arith.constant 0 : i32
    return %c0_i32, %c0_i32_0 : i32, i32
  }
  func.func @transform_4(%arg0: i32) -> (i32, i32) {
    %c0_i32 = arith.constant 0 : i32
    %c0_i32_0 = arith.constant 0 : i32
    %c0_i32_1 = arith.constant 0 : i32
    return %c0_i32, %c0_i32_0 : i32, i32
  }
  func.func @transform_5(%arg0: i32) -> (i32, i32) {
    %c0_i32 = arith.constant 0 : i32
    %c0_i32_0 = arith.constant 0 : i32
    %c0_i32_1 = arith.constant 0 : i32
    return %c0_i32, %c0_i32_0 : i32, i32
  }
  func.func @transform_6(%arg0: i32) -> (i32, i32) {
    %c0_i32 = arith.constant 0 : i32
    %c0_i32_0 = arith.constant 0 : i32
    return %arg0, %c0_i32 : i32, i32
  }
}

module attributes {stable_mosaic.version = 11 : i64} {
  func.func @_adaptive_dist_kernel(%arg0: i32, %arg1: memref<16x64xbf16, #tpu.memory_space<vmem>>, %arg2: memref<16x128xbf16, #tpu.memory_space<vmem>>, %arg3: memref<64x128xbf16, #tpu.memory_space<vmem>>, %arg4: memref<1x128xf32, #tpu.memory_space<vmem>>, %arg5: memref<128x768xbf16, #tpu.memory_space<vmem>>, %arg6: memref<1x768xf32, #tpu.memory_space<vmem>>, %arg7: memref<16x640xf32, #tpu.memory_space<vmem>>) attributes {dimension_semantics = [#tpu.dimension_semantics<parallel>], iteration_bounds = array<i64: 1>, scalar_prefetch = 0 : i64, scratch_operands = 0 : i64, tpu.core_type = #tpu.core_type<tc>, window_params = [{transform_indices = @transform_0, window_bounds = array<i64: 16, 64>}, {transform_indices = @transform_1, window_bounds = array<i64: 16, 128>}, {pipeline_mode = #tpu.pipeline_mode<synchronous>, transform_indices = @transform_2, window_bounds = array<i64: 64, 128>}, {pipeline_mode = #tpu.pipeline_mode<synchronous>, transform_indices = @transform_3, window_bounds = array<i64: 1, 128>}, {pipeline_mode = #tpu.pipeline_mode<synchronous>, transform_indices = @transform_4, window_bounds = array<i64: 128, 768>}, {pipeline_mode = #tpu.pipeline_mode<synchronous>, transform_indices = @transform_5, window_bounds = array<i64: 1, 768>}, {transform_indices = @transform_6, window_bounds = array<i64: 16, 640>}]} {
    %c0 = arith.constant 0 : index
    %c0_0 = arith.constant 0 : index
    %0 = vector.load %arg1[%c0, %c0_0] : memref<16x64xbf16, #tpu.memory_space<vmem>>, vector<16x64xbf16>
    %c0_1 = arith.constant 0 : index
    %c0_2 = arith.constant 0 : index
    %1 = vector.load %arg3[%c0_1, %c0_2] : memref<64x128xbf16, #tpu.memory_space<vmem>>, vector<64x128xbf16>
    %cst = arith.constant dense<0.000000e+00> : vector<16x128xf32>
    %2 = tpu.matmul %0, %1, %cst {dimension_numbers = #tpu.dot_dimension_numbers<[1], [0], [0], [1], [0, 0, 1, 1], [], []>} : vector<16x64xbf16>, vector<64x128xbf16>, vector<16x128xf32> -> vector<16x128xf32>
    %c0_3 = arith.constant 0 : index
    %c0_4 = arith.constant 0 : index
    %3 = vector.load %arg4[%c0_3, %c0_4] : memref<1x128xf32, #tpu.memory_space<vmem>>, vector<1x128xf32>
    %4 = vector.broadcast %3 : vector<1x128xf32> to vector<16x128xf32>
    %5 = arith.addf %2, %4 : vector<16x128xf32>
    %6 = arith.truncf %5 : vector<16x128xf32> to vector<16x128xbf16>
    %c0_5 = arith.constant 0 : index
    %c0_6 = arith.constant 0 : index
    %7 = vector.load %arg5[%c0_5, %c0_6] : memref<128x768xbf16, #tpu.memory_space<vmem>>, vector<128x768xbf16>
    %cst_7 = arith.constant dense<0.000000e+00> : vector<16x768xf32>
    %8 = tpu.matmul %6, %7, %cst_7 {dimension_numbers = #tpu.dot_dimension_numbers<[1], [0], [0], [1], [0, 0, 1, 1], [], []>} : vector<16x128xbf16>, vector<128x768xbf16>, vector<16x768xf32> -> vector<16x768xf32>
    %c0_8 = arith.constant 0 : index
    %c0_9 = arith.constant 0 : index
    %9 = vector.load %arg6[%c0_8, %c0_9] : memref<1x768xf32, #tpu.memory_space<vmem>>, vector<1x768xf32>
    %10 = vector.broadcast %9 : vector<1x768xf32> to vector<16x768xf32>
    %11 = arith.addf %8, %10 : vector<16x768xf32>
    %12 = vector.extract_strided_slice %11 {offsets = [0, 0], sizes = [16, 128], strides = [1, 1]} : vector<16x768xf32> to vector<16x128xf32>
    %13 = vector.extract_strided_slice %11 {offsets = [0, 128], sizes = [16, 128], strides = [1, 1]} : vector<16x768xf32> to vector<16x128xf32>
    %14 = vector.extract_strided_slice %11 {offsets = [0, 256], sizes = [16, 128], strides = [1, 1]} : vector<16x768xf32> to vector<16x128xf32>
    %15 = vector.extract_strided_slice %11 {offsets = [0, 384], sizes = [16, 128], strides = [1, 1]} : vector<16x768xf32> to vector<16x128xf32>
    %16 = vector.extract_strided_slice %11 {offsets = [0, 512], sizes = [16, 128], strides = [1, 1]} : vector<16x768xf32> to vector<16x128xf32>
    %17 = vector.extract_strided_slice %11 {offsets = [0, 640], sizes = [16, 128], strides = [1, 1]} : vector<16x768xf32> to vector<16x128xf32>
    %cst_10 = arith.constant dense<0xFF800000> : vector<16xf32>
    %18 = vector.multi_reduction <maximumf>, %12, %cst_10 [1] : vector<16x128xf32> to vector<16xf32>
    %19 = vector.shape_cast %18 : vector<16xf32> to vector<16x1xf32>
    %20 = vector.broadcast %19 : vector<16x1xf32> to vector<16x128xf32>
    %21 = arith.subf %12, %20 : vector<16x128xf32>
    %22 = math.exp %21 : vector<16x128xf32>
    %cst_11 = arith.constant dense<0.000000e+00> : vector<16xf32>
    %23 = vector.multi_reduction <add>, %22, %cst_11 [1] : vector<16x128xf32> to vector<16xf32>
    %24 = vector.shape_cast %23 : vector<16xf32> to vector<16x1xf32>
    %25 = vector.broadcast %24 : vector<16x1xf32> to vector<16x128xf32>
    %26 = arith.divf %22, %25 : vector<16x128xf32>
    %cst_12 = arith.constant 0.000000e+00 : f32
    %27 = vector.broadcast %cst_12 : f32 to vector<16x128xf32>
    %28 = arith.maximumf %14, %27 : vector<16x128xf32>
    %29 = vector.broadcast %cst_12 : f32 to vector<16x128xf32>
    %30 = arith.subf %14, %29 : vector<16x128xf32>
    %31 = arith.cmpf one, %30, %30 : vector<16x128xf32>
    %32 = vector.broadcast %cst_12 : f32 to vector<16x128xf32>
    %33 = arith.addf %14, %32 : vector<16x128xf32>
    %34 = math.absf %30 : vector<16x128xf32>
    %cst_13 = arith.constant 0.000000e+00 : f32
    %35 = vector.broadcast %cst_13 : f32 to vector<16x128xf32>
    %36 = arith.subf %35, %34 : vector<16x128xf32>
    %37 = math.exp %36 : vector<16x128xf32>
    %38 = math.log1p %37 : vector<16x128xf32>
    %39 = arith.addf %28, %38 : vector<16x128xf32>
    %40 = arith.select %31, %33, %39 : vector<16x128xi1>, vector<16x128xf32>
    %cst_14 = arith.constant 0.000000e+00 : f32
    %41 = vector.broadcast %cst_14 : f32 to vector<16x128xf32>
    %42 = arith.maximumf %15, %41 : vector<16x128xf32>
    %43 = vector.broadcast %cst_14 : f32 to vector<16x128xf32>
    %44 = arith.subf %15, %43 : vector<16x128xf32>
    %45 = arith.cmpf one, %44, %44 : vector<16x128xf32>
    %46 = vector.broadcast %cst_14 : f32 to vector<16x128xf32>
    %47 = arith.addf %15, %46 : vector<16x128xf32>
    %48 = math.absf %44 : vector<16x128xf32>
    %cst_15 = arith.constant 0.000000e+00 : f32
    %49 = vector.broadcast %cst_15 : f32 to vector<16x128xf32>
    %50 = arith.subf %49, %48 : vector<16x128xf32>
    %51 = math.exp %50 : vector<16x128xf32>
    %52 = math.log1p %51 : vector<16x128xf32>
    %53 = arith.addf %42, %52 : vector<16x128xf32>
    %54 = arith.select %45, %47, %53 : vector<16x128xi1>, vector<16x128xf32>
    %cst_16 = arith.constant 2.000000e+00 : f32
    %55 = vector.broadcast %cst_16 : f32 to vector<16x128xf32>
    %56 = arith.addf %54, %55 : vector<16x128xf32>
    %cst_17 = arith.constant 0.000000e+00 : f32
    %57 = vector.broadcast %cst_17 : f32 to vector<16x128xf32>
    %58 = arith.maximumf %17, %57 : vector<16x128xf32>
    %59 = vector.broadcast %cst_17 : f32 to vector<16x128xf32>
    %60 = arith.subf %17, %59 : vector<16x128xf32>
    %61 = arith.cmpf one, %60, %60 : vector<16x128xf32>
    %62 = vector.broadcast %cst_17 : f32 to vector<16x128xf32>
    %63 = arith.addf %17, %62 : vector<16x128xf32>
    %64 = math.absf %60 : vector<16x128xf32>
    %cst_18 = arith.constant 0.000000e+00 : f32
    %65 = vector.broadcast %cst_18 : f32 to vector<16x128xf32>
    %66 = arith.subf %65, %64 : vector<16x128xf32>
    %67 = math.exp %66 : vector<16x128xf32>
    %68 = math.log1p %67 : vector<16x128xf32>
    %69 = arith.addf %58, %68 : vector<16x128xf32>
    %70 = arith.select %61, %63, %69 : vector<16x128xi1>, vector<16x128xf32>
    %c0_19 = arith.constant 0 : index
    %c0_20 = arith.constant 0 : index
    %71 = vector.load %arg2[%c0_19, %c0_20] : memref<16x128xbf16, #tpu.memory_space<vmem>>, vector<16x128xbf16>
    %72 = arith.extf %71 : vector<16x128xbf16> to vector<16x128xf32>
    %73 = arith.mulf %70, %72 : vector<16x128xf32>
    %74 = arith.addf %16, %73 : vector<16x128xf32>
    %c0_21 = arith.constant 0 : index
    %c0_22 = arith.constant 0 : index
    %75 = vector.load %arg7[%c0_21, %c0_22] : memref<16x640xf32, #tpu.memory_space<vmem>>, vector<16x128xf32>
    tpu.vector_store %arg7[%c0_21, %c0_22], %26 {strides = array<i32>} : memref<16x640xf32, #tpu.memory_space<vmem>>, vector<16x128xf32>,
    %c0_23 = arith.constant 0 : index
    %c128 = arith.constant 128 : index
    %76 = vector.load %arg7[%c0_23, %c128] : memref<16x640xf32, #tpu.memory_space<vmem>>, vector<16x128xf32>
    tpu.vector_store %arg7[%c0_23, %c128], %13 {strides = array<i32>} : memref<16x640xf32, #tpu.memory_space<vmem>>, vector<16x128xf32>,
    %c0_24 = arith.constant 0 : index
    %c256 = arith.constant 256 : index
    %77 = vector.load %arg7[%c0_24, %c256] : memref<16x640xf32, #tpu.memory_space<vmem>>, vector<16x128xf32>
    tpu.vector_store %arg7[%c0_24, %c256], %40 {strides = array<i32>} : memref<16x640xf32, #tpu.memory_space<vmem>>, vector<16x128xf32>,
    %c0_25 = arith.constant 0 : index
    %c384 = arith.constant 384 : index
    %78 = vector.load %arg7[%c0_25, %c384] : memref<16x640xf32, #tpu.memory_space<vmem>>, vector<16x128xf32>
    tpu.vector_store %arg7[%c0_25, %c384], %56 {strides = array<i32>} : memref<16x640xf32, #tpu.memory_space<vmem>>, vector<16x128xf32>,
    %c0_26 = arith.constant 0 : index
    %c512 = arith.constant 512 : index
    %79 = vector.load %arg7[%c0_26, %c512] : memref<16x640xf32, #tpu.memory_space<vmem>>, vector<16x128xf32>
    tpu.vector_store %arg7[%c0_26, %c512], %74 {strides = array<i32>} : memref<16x640xf32, #tpu.memory_space<vmem>>, vector<16x128xf32>,
    return
  }
  func.func @transform_0(%arg0: i32) -> (i32, i32) {
    %c0_i32 = arith.constant 0 : i32
    %c0_i32_0 = arith.constant 0 : i32
    return %arg0, %c0_i32 : i32, i32
  }
  func.func @transform_1(%arg0: i32) -> (i32, i32) {
    %c0_i32 = arith.constant 0 : i32
    %c0_i32_0 = arith.constant 0 : i32
    return %arg0, %c0_i32 : i32, i32
  }
  func.func @transform_2(%arg0: i32) -> (i32, i32) {
    %c0_i32 = arith.constant 0 : i32
    %c0_i32_0 = arith.constant 0 : i32
    %c0_i32_1 = arith.constant 0 : i32
    return %c0_i32, %c0_i32_0 : i32, i32
  }
  func.func @transform_3(%arg0: i32) -> (i32, i32) {
    %c0_i32 = arith.constant 0 : i32
    %c0_i32_0 = arith.constant 0 : i32
    %c0_i32_1 = arith.constant 0 : i32
    return %c0_i32, %c0_i32_0 : i32, i32
  }
  func.func @transform_4(%arg0: i32) -> (i32, i32) {
    %c0_i32 = arith.constant 0 : i32
    %c0_i32_0 = arith.constant 0 : i32
    %c0_i32_1 = arith.constant 0 : i32
    return %c0_i32, %c0_i32_0 : i32, i32
  }
  func.func @transform_5(%arg0: i32) -> (i32, i32) {
    %c0_i32 = arith.constant 0 : i32
    %c0_i32_0 = arith.constant 0 : i32
    %c0_i32_1 = arith.constant 0 : i32
    return %c0_i32, %c0_i32_0 : i32, i32
  }
  func.func @transform_6(%arg0: i32) -> (i32, i32) {
    %c0_i32 = arith.constant 0 : i32
    %c0_i32_0 = arith.constant 0 : i32
    return %arg0, %c0_i32 : i32, i32
  }
}

</mosaic_0001>

<bundles_post_ra>
// kernel: tpu_custom_call.1
= control target key start
LH: loop header
LB: loop body
LE: loop exit
PB: predicated region body
PF: predicated region fallthrough
CT: control target
= control target key end

     0   :  { %11 = vsyncpa [#allocation3], 0  ;;  %s1244_s0 = inlined_call_operand.hbm [shape: bf16[16,64], index: 0, kind: input, shape index: {}]   ;;  %s1245_s1 = inlined_call_operand.hbm [shape: bf16[16,128], index: 1, kind: input, shape index: {}]   ;;  %s1246_s2 = inlined_call_operand.hbm [shape: bf16[64,128], index: 2, kind: input, shape index: {}]   ;;  %s1247_s3 = inlined_call_operand.vmem [shape: f32[1,128], index: 3, kind: input, shape index: {}]   ;;  %s1248_s4 = inlined_call_operand.hbm [shape: bf16[128,768], index: 4, kind: input, shape index: {}]   ;;  %s1249_s5 = inlined_call_operand.vmem [shape: f32[1,768], index: 5, kind: input, shape index: {}]   ;;  %s1250_s6 = inlined_call_operand.hbm [shape: f32[16,640], index: 6, kind: output, shape index: {}]  }
   0x1   :  { %12 = vsyncpa [#allocation6], 0 }
   0x2   :  { %13 = vsyncpa [#allocation9], 0 }
   0x3   :  { %14 = vsyncpa [#allocation4], 0  ;;  %s1093_s21 = smov [#allocation5]   ;;  %s1094_s23 = smov [#allocation2]  }
   0x4   :  { %s32_s22 = sshll.u32 %s1093_s21, 4  ;;  %s20_s24 = sshll.u32 %s1094_s23, 4  ;;  %s33_s22 = int_to_ptr.vmem [resolvable:$true] %s32_s22  ;;  %s21_s24 = int_to_ptr.vmem [resolvable:$true] %s20_s24 }
   0x5   :  { %s993_s25 = scalar_lea.vmem %s33_s22, 128  ;;  %p998_p1 = scmp.lt.s32.totalorder %s33_s22, %s33_s22 }
   0x6   :  { %p994_p0 = scmp.ne.s32.totalorder %s33_s22, %s993_s25  ;;  %p999_p2 = scmp.lt.s32.totalorder %s993_s25, %s993_s25 }
   0x8   :  { %p1000_p3 = por %p999_p2, %p998_p1 }
   0xa   :  { %p1001_p4 = pnand %p1000_p3, %p994_p0 }
   0xc   :  { %1004 = shalt.err (!%p1001_p4)
}
   0xd   :  { %s1095_s26 = smov 64   ;;  %s1096_s27 = smov 4  }
   0xe   :  { %38 = dma.hbm_to_vmem [thread:$0]  %s1245_s1, 128, %s33_s22, [#allocation6], %s1095_s26, %s1095_s26, %s1096_s27  }
   0xf   :  { %s1013_s30 = scalar_lea.vmem %s21_s24, 128  ;;  %p1018_p6 = scmp.lt.s32.totalorder %s21_s24, %s21_s24 }
  0x10   :  { %p1014_p5 = scmp.ne.s32.totalorder %s21_s24, %s1013_s30  ;;  %p1019_p7 = scmp.lt.s32.totalorder %s1013_s30, %s1013_s30 }
  0x12   :  { %p1020_p8 = por %p1019_p7, %p1018_p6 }
  0x14   :  { %p1021_p9 = pnand %p1020_p8, %p1014_p5 }
  0x16   :  { %1024 = shalt.err (!%p1021_p9)
}
  0x17   :  { %26 = dma.hbm_to_vmem [thread:$0]  %s1244_s0, 128, %s21_s24, [#allocation3], %s1095_s26, %s1095_s26, %s1096_s27  }
  0x18   :  { %s1097_s9 = smov [#allocation7]   ;;  %s1098_s11 = smov [#allocation8]  }
  0x19   :  { %s44_s10 = sshll.u32 %s1097_s9, 4  ;;  %s58_s12 = sshll.u32 %s1098_s11, 4  ;;  %s45_s10 = int_to_ptr.vmem [resolvable:$true] %s44_s10  ;;  %s59_s12 = int_to_ptr.vmem [resolvable:$true] %s58_s12 }
  0x1a   :  { %s1033_s13 = scalar_lea.vmem %s45_s10, 512  ;;  %p1038_p11 = scmp.lt.s32.totalorder %s45_s10, %s45_s10 }
  0x1b   :  { %p1034_p10 = scmp.ne.s32.totalorder %s45_s10, %s1033_s13  ;;  %p1039_p12 = scmp.lt.s32.totalorder %s1033_s13, %s1033_s13 }
  0x1d   :  { %p1040_p13 = por %p1039_p12, %p1038_p11 }
  0x1f   :  { %p1041_p0 = pnand %p1040_p13, %p1034_p10 }
  0x21   :  { %1044 = shalt.err (!%p1041_p0)
}
  0x22   :  { %50 = dma.hbm_to_vmem [thread:$0]  %s1246_s2, 512, %s45_s10, [#allocation6], %s1095_s26, %s1095_s26, %s1096_s27  }
  0x23   :  { %s1053_s15 = scalar_lea.vmem %s59_s12, 6144  ;;  %p1058_p2 = scmp.lt.s32.totalorder %s59_s12, %s59_s12 }
  0x24   :  { %p1054_p1 = scmp.ne.s32.totalorder %s59_s12, %s1053_s15  ;;  %p1059_p3 = scmp.lt.s32.totalorder %s1053_s15, %s1053_s15 }
  0x26   :  { %p1060_p4 = por %p1059_p3, %p1058_p2 }
  0x28   :  { %p1061_p5 = pnand %p1060_p4, %p1054_p1 }
  0x2a   :  { %1064 = shalt.err (!%p1061_p5)
}
  0x2b   :  { %s1099_s0 = smov 384   ;;  %s1100_s16 = smov 24  }
  0x2c   :  { %64 = dma.hbm_to_vmem [thread:$0]  %s1248_s4, 6144, %s59_s12, [#allocation9], %s1099_s0, %s1099_s0, %s1100_s16  }
  0x2d   :  { %1085 = dma.done.wait [#allocation3], 128  }
  0x2e   :  { %1086 = vsyncadd [#allocation3], 4294967168 }
  0x2f   :  { %1087 = dma.done.wait [#allocation6], 640  }
  0x30   :  { %1088 = vsyncadd [#allocation6], 4294966656 }
  0x31   :  { %1089 = dma.done.wait [#allocation9], 6144  }
  0x32   :  { %1090 = vsyncadd [#allocation9], 4294961152  ;;  %v1101_v0 = vmov 0.0   ;;  %vm1102_vm0 = vmmov 0   ;;  %v876_v1 = vld [vmem:[#allocation7 + $0x18] sm:$0xff]   ;;  %v877_v2 = vld [vmem:[#allocation7 + $0x10] sm:$0xff]   ;;  %v222_v63 = vlaneseq }
  0x33   :  { %850 = vmatprep.subr.bf16.mxu0 %v1101_v0  ;;  %858 = vmatprep.mubr.msk.bf16.mxu0 %vm1102_vm0, %v1101_v0  ;;  %v878_v3 = vld [vmem:[#allocation7 + $0x8] sm:$0xff]   ;;  %v887_v6 = vld [vmem:[#allocation8 + $0x124] ss:$24 sps:$4 sm:$0xff]   ;;  %v889_v7 = vld [vmem:[#allocation8 + $0x120] ss:$24 sps:$4 sm:$0xff]   ;;  %vm126_vm1 = vcmask 523264  }
  0x34   :  { %851 = vmatpush3.bf16.msra.mxu0 %v876_v1  ;;  %v881_v4 = vld [vmem:[#allocation8 + $0x154] ss:$24 sps:$4 sm:$0xff]   ;;  %v883_v5 = vld [vmem:[#allocation8 + $0x150] ss:$24 sps:$4 sm:$0xff]   ;;  %v879_v8 = vld [vmem:[#allocation7] sm:$0xff]   ;;  %v1103_v39 = vmov 0  }
  0x35   :  { %852 = vmatprep.subr.bf16.mxu0 %v1101_v0  ;;  %492 = vmatprep.subr.bf16.mxu1 %v881_v4  ;;  %v886_v9 = vld [vmem:[#allocation8 + $0x15c] ss:$24 sps:$4 sm:$0xff]   ;;  %v895_v12 = vld [vmem:[#allocation8 + $0xf0] ss:$24 sps:$4 sm:$0xff]   ;;  %v892_v15 = vld [vmem:[#allocation8 + $0x12c] ss:$24 sps:$4 sm:$0xff]  }
  0x36   :  { %493 = vmatpush1.bf16.msra.mxu1 %v883_v5  ;;  %v893_v10 = vld [vmem:[#allocation8 + $0xf4] ss:$24 sps:$4 sm:$0xff]   ;;  %v899_v13 = vld [vmem:[#allocation8 + $0xc4] ss:$24 sps:$4 sm:$0xff]   ;;  %v884_v14 = vld [vmem:[#allocation8 + $0x158] ss:$24 sps:$4 sm:$0xff]   ;;  %524 = vmatprep.mubr.bf16.mxu1 %v1103_v39 }
  0x37   :  { %494 = vmatprep.subr.bf16.mxu1 %v887_v6  ;;  %v880_v11 = vld [vmem:[#allocation2] sm:$0xff]   ;;  %v901_v16 = vld [vmem:[#allocation8 + $0xc0] ss:$24 sps:$4 sm:$0xff]   ;;  %v904_v22 = vld [vmem:[#allocation8 + $0xcc] ss:$24 sps:$4 sm:$0xff]  }
  0x38   :  { %853 = vmatpush3.bf16.msra.mxu0 %v877_v2  ;;  %v905_v17 = vld [vmem:[#allocation8 + $0x94] ss:$24 sps:$4 sm:$0xff]   ;;  %v890_v18 = vld [vmem:[#allocation8 + $0x128] ss:$24 sps:$4 sm:$0xff]   ;;  %v896_v20 = vld [vmem:[#allocation8 + $0xf8] ss:$24 sps:$4 sm:$0xff]  }
  0x39   :  { %854 = vmatprep.subr.bf16.mxu0 %v1101_v0  ;;  %v898_v19 = vld [vmem:[#allocation8 + $0xfc] ss:$24 sps:$4 sm:$0xff]   ;;  %v907_v21 = vld [vmem:[#allocation8 + $0x90] ss:$24 sps:$4 sm:$0xff]   ;;  %v913_v24 = vld [vmem:[#allocation8 + $0x60] ss:$24 sps:$4 sm:$0xff]  }
  0x3a   :  { %495 = vmatpush1.bf16.msra.mxu1 %v889_v7  ;;  %v911_v23 = vld [vmem:[#allocation8 + $0x64] ss:$24 sps:$4 sm:$0xff]   ;;  %v902_v25 = vld [vmem:[#allocation8 + $0xc8] ss:$24 sps:$4 sm:$0xff]   ;;  %v908_v27 = vld [vmem:[#allocation8 + $0x98] ss:$24 sps:$4 sm:$0xff]  }
  0x3b   :  { %496 = vmatprep.subr.bf16.mxu1 %v893_v10  ;;  %v910_v26 = vld [vmem:[#allocation8 + $0x9c] ss:$24 sps:$4 sm:$0xff]   ;;  %v916_v28 = vld [vmem:[#allocation8 + $0x6c] ss:$24 sps:$4 sm:$0xff]   ;;  %v914_v29 = vld [vmem:[#allocation8 + $0x68] ss:$24 sps:$4 sm:$0xff]  }
  0x3c   :  { %855 = vmatpush3.bf16.msra.mxu0 %v878_v3  ;;  %v917_v30 = vld [vmem:[#allocation8 + $0x34] ss:$24 sps:$4 sm:$0xff]   ;;  %v919_v31 = vld [vmem:[#allocation8 + $0x30] ss:$24 sps:$4 sm:$0xff]   ;;  %v923_v34 = vld [vmem:[#allocation8 + $0x4] ss:$24 sps:$4 sm:$0xff]  }
  0x3d   :  { %856 = vmatprep.subr.bf16.mxu0 %v1101_v0  ;;  %v922_v32 = vld [vmem:[#allocation8 + $0x3c] ss:$24 sps:$4 sm:$0xff]   ;;  %v920_v33 = vld [vmem:[#allocation8 + $0x38] ss:$24 sps:$4 sm:$0xff]   ;;  %v928_v36 = vld [vmem:[#allocation8 + $0xc] ss:$24 sps:$4 sm:$0xff]  }
  0x3e   :  { %497 = vmatpush1.bf16.msra.mxu1 %v895_v12  ;;  %v925_v35 = vld [vmem:[#allocation8] ss:$24 sps:$4 sm:$0xff]   ;;  %v931_v38 = vld [vmem:[#allocation8 + $0x164] ss:$24 sps:$4 sm:$0xff]   ;;  %v786_v41 = vld [vmem:[%s1247_s3] ss:$0 sm:$0xff] }
  0x3f   :  { %498 = vmatprep.subr.bf16.mxu1 %v899_v13  ;;  %v926_v37 = vld [vmem:[#allocation8 + $0x8] ss:$24 sps:$4 sm:$0xff]   ;;  %v934_v49 = vld [vmem:[#allocation8 + $0x134] ss:$24 sps:$4 sm:$0xff]   ;;  %v937_v51 = vld [vmem:[#allocation8 + $0x104] ss:$24 sps:$4 sm:$0xff]  }
  0x40   :  { %857 = vmatpush3.bf16.msra.mxu0 %v879_v8  ;;  %v929_v47 = vld [vmem:[#allocation8 + $0x160] ss:$24 sps:$4 sm:$0xff]   ;;  %v932_v50 = vld [vmem:[#allocation8 + $0x130] ss:$24 sps:$4 sm:$0xff]   ;;  %v940_v53 = vld [vmem:[#allocation8 + $0xd4] ss:$24 sps:$4 sm:$0xff]  }
  0x41   :  { %535 = vmatprep.subr.bf16.mxu0 %v886_v9  ;;  %v935_v52 = vld [vmem:[#allocation8 + $0x100] ss:$24 sps:$4 sm:$0xff]   ;;  %v938_v54 = vld [vmem:[#allocation8 + $0xd0] ss:$24 sps:$4 sm:$0xff]   ;;  %v943_v55 = vld [vmem:[#allocation8 + $0xa4] ss:$24 sps:$4 sm:$0xff]  }
  0x42   :  { %499 = vmatpush1.bf16.msra.mxu1 %v901_v16  ;;  %v941_v56 = vld [vmem:[#allocation8 + $0xa0] ss:$24 sps:$4 sm:$0xff]   ;;  %v946_v57 = vld [vmem:[#allocation8 + $0x74] ss:$24 sps:$4 sm:$0xff]   ;;  %v944_v58 = vld [vmem:[#allocation8 + $0x70] ss:$24 sps:$4 sm:$0xff]  }
  0x43   :  { %859 = vmatmul.mubr.msk.bf16.vlgmr.msra.gmra.mxu0 %vm126_vm1, %v880_v11  ;;  %500 = vmatprep.subr.bf16.mxu1 %v905_v17  ;;  %v949_v59 = vld [vmem:[#allocation8 + $0x44] ss:$24 sps:$4 sm:$0xff]   ;;  %v947_v60 = vld [vmem:[#allocation8 + $0x40] ss:$24 sps:$4 sm:$0xff]   ;;  %v952_v61 = vld [vmem:[#allocation8 + $0x14] ss:$24 sps:$4 sm:$0xff]  }
  0x44   :  { %536 = vmatpush1.bf16.msra.mxu0 %v884_v14  ;;  %567 = vmatprep.mubr.bf16.mxu0 %v1103_v39  ;;  %v950_v62 = vld [vmem:[#allocation8 + $0x10] ss:$24 sps:$4 sm:$0xff]   ;;  %v1157_v0 = vshrl.u32 %v222_v63, 7 }
  0x45   :  { %537 = vmatprep.subr.bf16.mxu0 %v892_v15  ;;  %v1164_v3 = vld [vmem:[%s1249_s5] sm:$0x3f]  ;;  %s1104_s5 = smov [#allocation10]  }
  0x46   :  { %501 = vmatpush1.bf16.msra.mxu1 %v907_v21  ;;  %v224_v1 = vsub.s32 0, %v1157_v0  ;;  %v232_v2 = vsub.s32 2, %v1157_v0  ;;  %v228_v4 = vsub.s32 1, %v1157_v0  ;;  %v236_v5 = vsub.s32 3, %v1157_v0  ;;  %s772_s20 = sshll.u32 %s1104_s5, 4  ;;  %s773_s20 = int_to_ptr.vmem [resolvable:$true] %s772_s20 }
  0x47   :  { %502 = vmatprep.subr.bf16.mxu1 %v911_v23  ;;  %s1065_s21 = scalar_lea.vmem %s773_s20, 1280  ;;  %p1070_p7 = scmp.lt.s32.totalorder %s773_s20, %s773_s20 }
  0x48   :  { %538 = vmatpush1.bf16.msra.mxu0 %v890_v18  ;;  %v225_v6 = vrot.slane %v1164_v3, %v224_v1  ;;  %v233_v7 = vrot.slane %v1164_v3, %v232_v2  ;;  %v229_v8 = vrot.slane %v1164_v3, %v228_v4  ;;  %v237_v11 = vrot.slane %v1164_v3, %v236_v5  ;;  %p1066_p6 = scmp.ne.s32.totalorder %s773_s20, %s1065_s21  ;;  %p1071_p8 = scmp.lt.s32.totalorder %s1065_s21, %s1065_s21 }
  0x49   :  { %539 = vmatprep.subr.bf16.mxu0 %v898_v19 }
  0x4a   :  { %503 = vmatpush1.bf16.msra.mxu1 %v913_v24  ;;  %p1072_p9 = por %p1071_p8, %p1070_p7 }
  0x4b   :  { %504 = vmatprep.subr.bf16.mxu1 %v917_v30 }
  0x4c   :  { %540 = vmatpush1.bf16.msra.mxu0 %v896_v20  ;;  %p1073_p10 = pnand %p1072_p9, %p1066_p6 }
  0x4d   :  { %541 = vmatprep.subr.bf16.mxu0 %v904_v22 }
  0x4e   :  { %505 = vmatpush1.bf16.msra.mxu1 %v919_v31 }
  0x4f   :  { %506 = vmatprep.subr.bf16.mxu1 %v923_v34 }
  0x50   :  { %542 = vmatpush1.bf16.msra.mxu0 %v902_v25 }
  0x51   :  { %543 = vmatprep.subr.bf16.mxu0 %v910_v26 }
  0x52   :  { %507 = vmatpush1.bf16.msra.mxu1 %v925_v35 }
  0x53   :  { %578 = vmatprep.subr.bf16.mxu1 %v931_v38 }
  0x54   :  { %544 = vmatpush1.bf16.msra.mxu0 %v908_v27 }
  0x55   :  { %545 = vmatprep.subr.bf16.mxu0 %v916_v28 }
  0x58   :  { %546 = vmatpush1.bf16.msra.mxu0 %v914_v29 }
  0x59   :  { %547 = vmatprep.subr.bf16.mxu0 %v922_v32 }
  0x5c   :  { %548 = vmatpush1.bf16.msra.mxu0 %v920_v33 }
  0x5d   :  { %549 = vmatprep.subr.bf16.mxu0 %v928_v36 }
  0x60   :  { %550 = vmatpush1.bf16.msra.mxu0 %v926_v37 }
 0x103   :  { %v164_v40 = vpop.f32.mrf.mxu0 }
 0x104   :  { %v165_v44 = vadd.f32 %v786_v41, %v164_v40 }
 0x105   :  { %v860_v42 = vpop.f32.mrf.mxu0 }
 0x107   :  { %v167_v43 = vpop.f32.mrf.mxu0 }
 0x108   :  { %v168_v45 = vadd.f32 %v786_v41, %v167_v43 }
 0x109   :  { %v861_v46 = vpop.f32.mrf.mxu0 }
 0x10a   :  { %v171_v48 = vpack.c.bf16 %v168_v45, %v165_v44  ;;  %v244_v44 = vsub.s32 5, %v1157_v0 }
 0x10c   :  { %525 = vmatmul.mubr.bf16.vlgmr.msra.gmra.mxu1 %v171_v48  ;;  %568 = vmatmul.mubr.bf16.vlgmr.msra.gmra.mxu0 %v171_v48 }
 0x10d   :  { %579 = vmatpush1.bf16.msra.mxu1 %v929_v47  ;;  %610 = vmatprep.mubr.bf16.mxu1 %v1103_v39 }
 0x10e   :  { %580 = vmatprep.subr.bf16.mxu1 %v934_v49 }
 0x111   :  { %581 = vmatpush1.bf16.msra.mxu1 %v932_v50 }
 0x112   :  { %582 = vmatprep.subr.bf16.mxu1 %v937_v51 }
 0x115   :  { %583 = vmatpush1.bf16.msra.mxu1 %v935_v52 }
 0x116   :  { %584 = vmatprep.subr.bf16.mxu1 %v940_v53 }
 0x119   :  { %585 = vmatpush1.bf16.msra.mxu1 %v938_v54 }
 0x11a   :  { %586 = vmatprep.subr.bf16.mxu1 %v943_v55 }
 0x11d   :  { %587 = vmatpush1.bf16.msra.mxu1 %v941_v56 }
 0x11e   :  { %588 = vmatprep.subr.bf16.mxu1 %v946_v57 }
 0x121   :  { %589 = vmatpush1.bf16.msra.mxu1 %v944_v58 }
 0x122   :  { %590 = vmatprep.subr.bf16.mxu1 %v949_v59 }
 0x125   :  { %591 = vmatpush1.bf16.msra.mxu1 %v947_v60 }
 0x126   :  { %592 = vmatprep.subr.bf16.mxu1 %v952_v61 }
 0x129   :  { %593 = vmatpush1.bf16.msra.mxu1 %v950_v62 }
 0x12c   :  { %611 = vmatmul.mubr.bf16.vlgmr.msra.gmra.mxu1 %v171_v48  ;;  %v245_v48 = vrot.slane %v1164_v3, %v244_v44 }
 0x1cc   :  { %v526_v9 = vpop.f32.mrf.mxu1  ;;  %v569_v10 = vpop.f32.mrf.mxu0 }
 0x1cd   :  { %v1172_v12 = vadd.f32 %v526_v9, %v225_v6  ;;  %v1174_v13 = vadd.f32 %v569_v10, %v233_v7 }
 0x1ce   :  { %v528_v14 = vpop.f32.mrf.mxu1  ;;  %v571_v15 = vpop.f32.mrf.mxu0 }
 0x1cf   :  { %v645_v16 = vand.u32 2147483647, %v1174_v13  ;;  %v529_v17 = vadd.f32 %v528_v14, %v229_v8  ;;  %621 = vmax.xlane.f32.xlu0 %v1172_v12  ;;  %v1178_v18 = vadd.f32 %v571_v15, %v237_v11  ;;  %v639_v61 = vmax.f32 %v1174_v13, 0.0 }
 0x1d0   :  { %v530_v19 = vpop.f32.mrf.mxu1  ;;  %v573_v20 = vpop.f32.mrf.mxu0  ;;  %vm641_vm2 = vcmp.ne.f32.partialorder %v1174_v13, %v1174_v13 }
 0x1d1   :  { %v647_v21 = vsub.f32 0.0, %v645_v16  ;;  %759 = vst [vmem:[#allocation10 + $0x8] sm:$0xff] %v529_v17  ;;  %v1180_v22 = vadd.f32 %v530_v19, %v225_v6  ;;  %v1182_v23 = vadd.f32 %v573_v20, %v233_v7  ;;  %v681_v24 = vand.u32 2147483647, %v1178_v18 }
 0x1d2   :  { %v532_v25 = vpop.f32.mrf.mxu1  ;;  %v575_v26 = vpop.f32.mrf.mxu0  ;;  %v675_v7 = vmax.f32 %v1178_v18, 0.0  ;;  %vm677_vm6 = vcmp.ne.f32.partialorder %v1178_v18, %v1178_v18 }
 0x1d3   :  { %v649_v27 = vmul.f32 1.442695, %v647_v21  ;;  %v646_v28 = vand.u32 2147483647, %v1182_v23  ;;  %623 = vmax.xlane.f32.xlu0 %v1180_v22  ;;  %v683_v29 = vsub.f32 0.0, %v681_v24  ;;  %v533_v30 = vadd.f32 %v532_v25, %v229_v8 }
 0x1d4   :  { %v1187_v31 = vadd.f32 %v575_v26, %v237_v11  ;;  %v640_v8 = vmax.f32 %v1182_v23, 0.0  ;;  %vm642_vm7 = vcmp.ne.f32.partialorder %v1182_v23, %v1182_v23 }
 0x1d5   :  { %953 = vpow2.f32 %v649_v27  ;;  %v648_v32 = vsub.f32 0.0, %v646_v28  ;;  %v685_v33 = vmul.f32 1.442695, %v683_v29  ;;  %760 = vst [vmem:[#allocation10 + $0x30] sm:$0xff] %v533_v30 }
 0x1d6   :  { %v682_v34 = vand.u32 2147483647, %v1187_v31  ;;  %vm678_vm9 = vcmp.ne.f32.partialorder %v1187_v31, %v1187_v31 }
 0x1d7   :  { %v651_v35 = vmul.f32 1.442695, %v648_v32  ;;  %955 = vpow2.f32 %v685_v33 }
 0x1d8   :  { %v684_v36 = vsub.f32 0.0, %v682_v34 }
 0x1d9   :  { %957 = vpow2.f32 %v651_v35 }
 0x1da   :  { %v687_v37 = vmul.f32 1.442695, %v684_v36 }
 0x1dc   :  { %959 = vpow2.f32 %v687_v37 }
 0x1e2   :  { %v954_v38 = vpop.eup %953 }
 0x1e3   :  { %v653_v39 = vadd.f32 1.0, %v954_v38  ;;  %v656_v46 = vmul.f32 -0.5, %v954_v38  ;;  %v659_v55 = vand.u32 2147483647, %v954_v38 }
 0x1e4   :  { %v956_v40 = vpop.eup %955 }
 0x1e5   :  { %961 = vlog2.f32 %v653_v39  ;;  %v689_v42 = vadd.f32 1.0, %v956_v40  ;;  %v692_v50 = vmul.f32 -0.5, %v956_v40  ;;  %v657_v51 = vadd.f32 1.0, %v656_v46 }
 0x1e6   :  { %v958_v41 = vpop.eup %957  ;;  %v695_v58 = vand.u32 2147483647, %v956_v40  ;;  %vm660_vm3 = vcmp.lt.f32.partialorder %v659_v55, 0.0004427343 }
 0x1e7   :  { %v662_v43 = vadd.f32 1.0, %v958_v41  ;;  %963 = vlog2.f32 %v689_v42  ;;  %v665_v53 = vmul.f32 -0.5, %v958_v41  ;;  %v693_v57 = vadd.f32 1.0, %v692_v50 }
 0x1e8   :  { %v658_v62 = vmul.f32 %v954_v38, %v657_v51  ;;  %v668_v9 = vand.u32 2147483647, %v958_v41  ;;  %vm1206_vm4 = vcmp.lt.f32.partialorder %v695_v58, 0.0004427343 }
 0x1e9   :  { %v960_v45 = vpop.eup %959  ;;  %965 = vlog2.f32 %v662_v43  ;;  %v666_v4 = vadd.f32 1.0, %v665_v53  ;;  %v694_v14 = vmul.f32 %v956_v40, %v693_v57  ;;  %v240_v53 = vsub.s32 4, %v1157_v0  ;;  %v842_v57 = vld [vmem:[#allocation5] sm:$0xff]  }
 0x1ea   :  { %v698_v47 = vadd.f32 1.0, %v960_v45  ;;  %v701_v63 = vmul.f32 -0.5, %v960_v45  ;;  %v704_v27 = vand.u32 2147483647, %v960_v45  ;;  %vm669_vm5 = vcmp.lt.f32.partialorder %v668_v9, 0.0004427343 }
 0x1eb   :  { %v667_v26 = vmul.f32 %v958_v41, %v666_v4 }
 0x1ec   :  { %967 = vlog2.f32 %v698_v47  ;;  %v1192_v49 = vpop.f32.mrf.mxu1  ;;  %v702_v21 = vadd.f32 1.0, %v701_v63  ;;  %vm705_vm8 = vcmp.lt.f32.partialorder %v704_v27, 0.0004427343  ;;  %v843_v63 = vunpack.c.l.bf16 %v842_v57 }
 0x1ee   :  { %v614_v52 = vpop.f32.mrf.mxu1  ;;  %v703_v37 = vmul.f32 %v960_v45, %v702_v21 }
 0x1ef   :  { %v1194_v54 = vadd.f32 %v614_v52, %v245_v48 }
 0x1f0   :  { %v1196_v56 = vpop.f32.mrf.mxu1 }
 0x1f1   :  { %v719_v59 = vand.u32 2147483647, %v1194_v54  ;;  %vm715_vm11 = vcmp.ne.f32.partialorder %v1194_v54, %v1194_v54 }
 0x1f2   :  { %v962_v60 = vpop.eup %961  ;;  %v618_v1 = vpop.f32.mrf.mxu1 }
 0x1f3   :  { %v655_v2 = vmul.f32 0.6931472, %v962_v60  ;;  %v721_v5 = vsub.f32 0.0, %v719_v59  ;;  %v1202_v6 = vadd.f32 %v618_v1, %v245_v48 }
 0x1f4   :  { %v964_v10 = vpop.eup %963 }
 0x1f5   :  { %v661_v11 = vsel %vm660_vm3, %v658_v62, %v655_v2  ;;  %v723_v16 = vmul.f32 1.442695, %v721_v5  ;;  %v691_v20 = vmul.f32 0.6931472, %v964_v10  ;;  %v720_v24 = vand.u32 2147483647, %v1202_v6 }
 0x1f6   :  { %v966_v17 = vpop.eup %965  ;;  %v671_v19 = vadd.f32 %v661_v11, %v639_v61  ;;  %v241_v61 = vrot.slane %v1164_v3, %v240_v53  ;;  %v714_v10 = vmax.f32 %v1202_v6, 0.0  ;;  %v844_v3 = vunpack.c.h.bf16 %v842_v57 }
 0x1f7   :  { %v664_v25 = vmul.f32 0.6931472, %v966_v17  ;;  %969 = vpow2.f32 %v723_v16  ;;  %v697_v29 = vsel %vm1206_vm4, %v694_v14, %v691_v20  ;;  %v722_v30 = vsub.f32 0.0, %v720_v24 }
 0x1f8   :  { %v673_v28 = vsel %vm641_vm2, %v1174_v13, %v671_v19  ;;  %v707_v33 = vadd.f32 %v697_v29, %v675_v7  ;;  %v676_v13 = vmax.f32 %v1187_v31, 0.0  ;;  %vm716_vm13 = vcmp.ne.f32.partialorder %v1202_v6, %v1202_v6 }
 0x1f9   :  { %v968_v32 = vpop.eup %967  ;;  %761 = vst [vmem:[#allocation10 + $0x10] sm:$0xff] %v673_v28  ;;  %v670_v34 = vsel %vm669_vm5, %v667_v26, %v664_v25  ;;  %v725_v38 = vmul.f32 1.442695, %v722_v30 }
 0x1fa   :  { %v672_v35 = vadd.f32 %v670_v34, %v640_v8  ;;  %v700_v36 = vmul.f32 0.6931472, %v968_v32  ;;  %v709_v39 = vsel %vm677_vm6, %v1178_v18, %v707_v33  ;;  %v613_v8 = vadd.f32 %v1192_v49, %v241_v61 }
 0x1fb   :  { %v711_v40 = vadd.f32 2.0, %v709_v39  ;;  %971 = vpow2.f32 %v725_v38 }
 0x1fc   :  { %v674_v41 = vsel %vm642_vm7, %v1182_v23, %v672_v35  ;;  %v706_v42 = vsel %vm705_vm8, %v703_v37, %v700_v36 }
 0x1fd   :  { %762 = vst [vmem:[#allocation10 + $0x38] sm:$0xff] %v674_v41  ;;  %v708_v43 = vadd.f32 %v706_v42, %v676_v13  ;;  %763 = vst [vmem:[#allocation10 + $0x18] sm:$0xff] %v711_v40 }
 0x1ff   :  { %v710_v44 = vsel %vm678_vm9, %v1187_v31, %v708_v43  ;;  %v713_v31 = vmax.f32 %v1194_v54, 0.0 }
 0x200   :  { %v712_v18 = vadd.f32 2.0, %v710_v44 }
 0x202   :  { %764 = vst [vmem:[#allocation10 + $0x40] sm:$0xff] %v712_v18 }
 0x204   :  { %v970_v45 = vpop.eup %969 }
 0x205   :  { %v727_v46 = vadd.f32 1.0, %v970_v45  ;;  %v730_v50 = vmul.f32 -0.5, %v970_v45  ;;  %v733_v51 = vand.u32 2147483647, %v970_v45 }
 0x207   :  { %973 = vlog2.f32 %v727_v46  ;;  %v731_v23 = vadd.f32 1.0, %v730_v50  ;;  %vm734_vm10 = vcmp.lt.f32.partialorder %v733_v51, 0.0004427343 }
 0x208   :  { %v972_v47 = vpop.eup %971 }
 0x209   :  { %v736_v48 = vadd.f32 1.0, %v972_v47  ;;  %v739_v52 = vmul.f32 -0.5, %v972_v47  ;;  %v732_v59 = vmul.f32 %v970_v45, %v731_v23  ;;  %v742_v1 = vand.u32 2147483647, %v972_v47 }
 0x20b   :  { %975 = vlog2.f32 %v736_v48  ;;  %v740_v60 = vadd.f32 1.0, %v739_v52  ;;  %vm743_vm12 = vcmp.lt.f32.partialorder %v742_v1, 0.0004427343 }
 0x20d   :  { %v741_v7 = vmul.f32 %v972_v47, %v740_v60 }
 0x214   :  { %v974_v55 = vpop.eup %973 }
 0x215   :  { %v729_v58 = vmul.f32 0.6931472, %v974_v55 }
 0x217   :  { %v735_v62 = vsel %vm734_vm10, %v732_v59, %v729_v58 }
 0x218   :  { %v745_v2 = vadd.f32 %v735_v62, %v713_v31  ;;  %v976_v4 = vpop.eup %975 }
 0x219   :  { %v738_v5 = vmul.f32 0.6931472, %v976_v4 }
 0x21a   :  { %v747_v0 = vsel %vm715_vm11, %v1194_v54, %v745_v2  ;;  %v617_v54 = vadd.f32 %v1196_v56, %v241_v61 }
 0x21b   :  { %v753_v9 = vmul.f32 %v843_v63, %v747_v0  ;;  %v744_v11 = vsel %vm743_vm12, %v741_v7, %v738_v5 }
 0x21c   :  { %v746_v15 = vadd.f32 %v744_v11, %v714_v10 }
 0x21d   :  { %v755_v14 = vadd.f32 %v753_v9, %v613_v8 }
 0x21e   :  { %v748_v16 = vsel %vm716_vm13, %v1202_v6, %v746_v15 }
 0x21f   :  { %765 = vst [vmem:[#allocation10 + $0x20] sm:$0xff] %v755_v14  ;;  %v754_v17 = vmul.f32 %v844_v3, %v748_v16 }
 0x221   :  { %v756_v19 = vadd.f32 %v754_v17, %v617_v54 }
 0x223   :  { %766 = vst [vmem:[#allocation10 + $0x48] sm:$0xff] %v756_v19 }
 0x258   :  { %v622_v49 = vpop.xlane.xlu0 %621 }
 0x259   :  { %v625_v20 = vsub.f32 %v1172_v12, %v622_v49 }
 0x25b   :  { %v627_v21 = vmul.f32 1.442695, %v625_v20 }
 0x25c   :  { %v624_v24 = vpop.xlane.xlu0 %623 }
 0x25d   :  { %977 = vpow2.f32 %v627_v21  ;;  %v626_v25 = vsub.f32 %v1180_v22, %v624_v24 }
 0x25f   :  { %v629_v26 = vmul.f32 1.442695, %v626_v25 }
 0x261   :  { %979 = vpow2.f32 %v629_v26 }
 0x26a   :  { %v978_v27 = vpop.eup %977 }
 0x26b   :  { %631 = vadd.xlane.f32.xlu1 %v978_v27 }
 0x26e   :  { %v980_v28 = vpop.eup %979 }
 0x26f   :  { %633 = vadd.xlane.f32.xlu1 %v980_v28 }
 0x2f4   :  { %v632_v6 = vpop.xlane.xlu1 %631 }
 0x2f5   :  { %981 = vrcp.f32 %v632_v6 }
 0x2f8   :  { %v634_v56 = vpop.xlane.xlu1 %633 }
 0x2f9   :  { %983 = vrcp.f32 %v634_v56 }
 0x302   :  { %v982_v29 = vpop.eup %981 }
 0x303   :  { %v636_v30 = vmul.f32 %v982_v29, %v978_v27 }
 0x305   :  { %757 = vst [vmem:[#allocation10] sm:$0xff] %v636_v30 }
 0x306   :  { %v984_v12 = vpop.eup %983 }
 0x307   :  { %v638_v32 = vmul.f32 %v984_v12, %v980_v28 }
 0x309   :  { %758 = vst [vmem:[#allocation10 + $0x28] sm:$0xff] %v638_v32 }
 0x30a   :  { %1076 = shalt.err (!%p1073_p10)
}
 0x30b   :  { %s1105_s22 = smov 640   ;;  %s1106_s23 = smov 40  }
 0x30c   :  { %778 = dma.vmem_to_hbm [thread:$0]  %s773_s20, 1280, %s1250_s6, [#allocation4], %s1105_s22, %s1105_s22, %s1106_s23  }
 0x30d   :  { %1091 = dma.done.wait [#allocation4], 1280  }
 0x30e   :  { %1092 = vsyncadd [#allocation4], 4294966016 }
 0x30f   :  { %782 = vsyncpa [#allocation3], 1 }
 0x310   :  { %783 = vsyncpa [#allocation6], 1 }
 0x311   :  { %784 = vsyncpa [#allocation9], 1 }
 0x312   :  { %785 = vsyncpa [#allocation4], 1 }

// kernel: tpu_custom_call.1
= control target key start
LH: loop header
LB: loop body
LE: loop exit
PB: predicated region body
PF: predicated region fallthrough
CT: control target
= control target key end

     0   :  { %11 = vsyncpa [#allocation3], 0  ;;  %s1244_s0 = inlined_call_operand.hbm [shape: bf16[16,64], index: 0, kind: input, shape index: {}]   ;;  %s1245_s1 = inlined_call_operand.hbm [shape: bf16[16,128], index: 1, kind: input, shape index: {}]   ;;  %s1246_s2 = inlined_call_operand.hbm [shape: bf16[64,128], index: 2, kind: input, shape index: {}]   ;;  %s1247_s3 = inlined_call_operand.vmem [shape: f32[1,128], index: 3, kind: input, shape index: {}]   ;;  %s1248_s4 = inlined_call_operand.hbm [shape: bf16[128,768], index: 4, kind: input, shape index: {}]   ;;  %s1249_s5 = inlined_call_operand.vmem [shape: f32[1,768], index: 5, kind: input, shape index: {}]   ;;  %s1250_s6 = inlined_call_operand.hbm [shape: f32[16,640], index: 6, kind: output, shape index: {}]  }
   0x1   :  { %12 = vsyncpa [#allocation6], 0 }
   0x2   :  { %13 = vsyncpa [#allocation9], 0 }
   0x3   :  { %14 = vsyncpa [#allocation4], 0  ;;  %s1093_s21 = smov [#allocation5]   ;;  %s1094_s23 = smov [#allocation2]  }
   0x4   :  { %s32_s22 = sshll.u32 %s1093_s21, 4  ;;  %s20_s24 = sshll.u32 %s1094_s23, 4  ;;  %s33_s22 = int_to_ptr.vmem [resolvable:$true] %s32_s22  ;;  %s21_s24 = int_to_ptr.vmem [resolvable:$true] %s20_s24 }
   0x5   :  { %s993_s25 = scalar_lea.vmem %s33_s22, 128  ;;  %p998_p1 = scmp.lt.s32.totalorder %s33_s22, %s33_s22 }
   0x6   :  { %p994_p0 = scmp.ne.s32.totalorder %s33_s22, %s993_s25  ;;  %p999_p2 = scmp.lt.s32.totalorder %s993_s25, %s993_s25 }
   0x8   :  { %p1000_p3 = por %p999_p2, %p998_p1 }
   0xa   :  { %p1001_p4 = pnand %p1000_p3, %p994_p0 }
   0xc   :  { %1004 = shalt.err (!%p1001_p4)
}
   0xd   :  { %s1095_s26 = smov 64   ;;  %s1096_s27 = smov 4  }
   0xe   :  { %38 = dma.hbm_to_vmem [thread:$0]  %s1245_s1, 128, %s33_s22, [#allocation6], %s1095_s26, %s1095_s26, %s1096_s27  }
   0xf   :  { %s1013_s30 = scalar_lea.vmem %s21_s24, 128  ;;  %p1018_p6 = scmp.lt.s32.totalorder %s21_s24, %s21_s24 }
  0x10   :  { %p1014_p5 = scmp.ne.s32.totalorder %s21_s24, %s1013_s30  ;;  %p1019_p7 = scmp.lt.s32.totalorder %s1013_s30, %s1013_s30 }
  0x12   :  { %p1020_p8 = por %p1019_p7, %p1018_p6 }
  0x14   :  { %p1021_p9 = pnand %p1020_p8, %p1014_p5 }
  0x16   :  { %1024 = shalt.err (!%p1021_p9)
}
  0x17   :  { %26 = dma.hbm_to_vmem [thread:$0]  %s1244_s0, 128, %s21_s24, [#allocation3], %s1095_s26, %s1095_s26, %s1096_s27  }
  0x18   :  { %s1097_s9 = smov [#allocation7]   ;;  %s1098_s11 = smov [#allocation8]  }
  0x19   :  { %s44_s10 = sshll.u32 %s1097_s9, 4  ;;  %s58_s12 = sshll.u32 %s1098_s11, 4  ;;  %s45_s10 = int_to_ptr.vmem [resolvable:$true] %s44_s10  ;;  %s59_s12 = int_to_ptr.vmem [resolvable:$true] %s58_s12 }
  0x1a   :  { %s1033_s13 = scalar_lea.vmem %s45_s10, 512  ;;  %p1038_p11 = scmp.lt.s32.totalorder %s45_s10, %s45_s10 }
  0x1b   :  { %p1034_p10 = scmp.ne.s32.totalorder %s45_s10, %s1033_s13  ;;  %p1039_p12 = scmp.lt.s32.totalorder %s1033_s13, %s1033_s13 }
  0x1d   :  { %p1040_p13 = por %p1039_p12, %p1038_p11 }
  0x1f   :  { %p1041_p0 = pnand %p1040_p13, %p1034_p10 }
  0x21   :  { %1044 = shalt.err (!%p1041_p0)
}
  0x22   :  { %50 = dma.hbm_to_vmem [thread:$0]  %s1246_s2, 512, %s45_s10, [#allocation6], %s1095_s26, %s1095_s26, %s1096_s27  }
  0x23   :  { %s1053_s15 = scalar_lea.vmem %s59_s12, 6144  ;;  %p1058_p2 = scmp.lt.s32.totalorder %s59_s12, %s59_s12 }
  0x24   :  { %p1054_p1 = scmp.ne.s32.totalorder %s59_s12, %s1053_s15  ;;  %p1059_p3 = scmp.lt.s32.totalorder %s1053_s15, %s1053_s15 }
  0x26   :  { %p1060_p4 = por %p1059_p3, %p1058_p2 }
  0x28   :  { %p1061_p5 = pnand %p1060_p4, %p1054_p1 }
  0x2a   :  { %1064 = shalt.err (!%p1061_p5)
}
  0x2b   :  { %s1099_s0 = smov 384   ;;  %s1100_s16 = smov 24  }
  0x2c   :  { %64 = dma.hbm_to_vmem [thread:$0]  %s1248_s4, 6144, %s59_s12, [#allocation9], %s1099_s0, %s1099_s0, %s1100_s16  }
  0x2d   :  { %1085 = dma.done.wait [#allocation3], 128  }
  0x2e   :  { %1086 = vsyncadd [#allocation3], 4294967168 }
  0x2f   :  { %1087 = dma.done.wait [#allocation6], 640  }
  0x30   :  { %1088 = vsyncadd [#allocation6], 4294966656 }
  0x31   :  { %1089 = dma.done.wait [#allocation9], 6144  }
  0x32   :  { %1090 = vsyncadd [#allocation9], 4294961152  ;;  %v1101_v0 = vmov 0.0   ;;  %vm1102_vm0 = vmmov 0   ;;  %v876_v1 = vld [vmem:[#allocation7 + $0x18] sm:$0xff]   ;;  %v877_v2 = vld [vmem:[#allocation7 + $0x10] sm:$0xff]   ;;  %v222_v63 = vlaneseq }
  0x33   :  { %850 = vmatprep.subr.bf16.mxu0 %v1101_v0  ;;  %858 = vmatprep.mubr.msk.bf16.mxu0 %vm1102_vm0, %v1101_v0  ;;  %v878_v3 = vld [vmem:[#allocation7 + $0x8] sm:$0xff]   ;;  %v887_v6 = vld [vmem:[#allocation8 + $0x124] ss:$24 sps:$4 sm:$0xff]   ;;  %v889_v7 = vld [vmem:[#allocation8 + $0x120] ss:$24 sps:$4 sm:$0xff]   ;;  %vm126_vm1 = vcmask 523264  }
  0x34   :  { %851 = vmatpush3.bf16.msra.mxu0 %v876_v1  ;;  %v881_v4 = vld [vmem:[#allocation8 + $0x154] ss:$24 sps:$4 sm:$0xff]   ;;  %v883_v5 = vld [vmem:[#allocation8 + $0x150] ss:$24 sps:$4 sm:$0xff]   ;;  %v879_v8 = vld [vmem:[#allocation7] sm:$0xff]   ;;  %v1103_v39 = vmov 0  }
  0x35   :  { %852 = vmatprep.subr.bf16.mxu0 %v1101_v0  ;;  %492 = vmatprep.subr.bf16.mxu1 %v881_v4  ;;  %v886_v9 = vld [vmem:[#allocation8 + $0x15c] ss:$24 sps:$4 sm:$0xff]   ;;  %v895_v12 = vld [vmem:[#allocation8 + $0xf0] ss:$24 sps:$4 sm:$0xff]   ;;  %v892_v15 = vld [vmem:[#allocation8 + $0x12c] ss:$24 sps:$4 sm:$0xff]  }
  0x36   :  { %493 = vmatpush1.bf16.msra.mxu1 %v883_v5  ;;  %v893_v10 = vld [vmem:[#allocation8 + $0xf4] ss:$24 sps:$4 sm:$0xff]   ;;  %v899_v13 = vld [vmem:[#allocation8 + $0xc4] ss:$24 sps:$4 sm:$0xff]   ;;  %v884_v14 = vld [vmem:[#allocation8 + $0x158] ss:$24 sps:$4 sm:$0xff]   ;;  %524 = vmatprep.mubr.bf16.mxu1 %v1103_v39 }
  0x37   :  { %494 = vmatprep.subr.bf16.mxu1 %v887_v6  ;;  %v880_v11 = vld [vmem:[#allocation2] sm:$0xff]   ;;  %v901_v16 = vld [vmem:[#allocation8 + $0xc0] ss:$24 sps:$4 sm:$0xff]   ;;  %v904_v22 = vld [vmem:[#allocation8 + $0xcc] ss:$24 sps:$4 sm:$0xff]  }
  0x38   :  { %853 = vmatpush3.bf16.msra.mxu0 %v877_v2  ;;  %v905_v17 = vld [vmem:[#allocation8 + $0x94] ss:$24 sps:$4 sm:$0xff]   ;;  %v890_v18 = vld [vmem:[#allocation8 + $0x128] ss:$24 sps:$4 sm:$0xff]   ;;  %v896_v20 = vld [vmem:[#allocation8 + $0xf8] ss:$24 sps:$4 sm:$0xff]  }
  0x39   :  { %854 = vmatprep.subr.bf16.mxu0 %v1101_v0  ;;  %v898_v19 = vld [vmem:[#allocation8 + $0xfc] ss:$24 sps:$4 sm:$0xff]   ;;  %v907_v21 = vld [vmem:[#allocation8 + $0x90] ss:$24 sps:$4 sm:$0xff]   ;;  %v913_v24 = vld [vmem:[#allocation8 + $0x60] ss:$24 sps:$4 sm:$0xff]  }
  0x3a   :  { %495 = vmatpush1.bf16.msra.mxu1 %v889_v7  ;;  %v911_v23 = vld [vmem:[#allocation8 + $0x64] ss:$24 sps:$4 sm:$0xff]   ;;  %v902_v25 = vld [vmem:[#allocation8 + $0xc8] ss:$24 sps:$4 sm:$0xff]   ;;  %v908_v27 = vld [vmem:[#allocation8 + $0x98] ss:$24 sps:$4 sm:$0xff]  }
  0x3b   :  { %496 = vmatprep.subr.bf16.mxu1 %v893_v10  ;;  %v910_v26 = vld [vmem:[#allocation8 + $0x9c] ss:$24 sps:$4 sm:$0xff]   ;;  %v916_v28 = vld [vmem:[#allocation8 + $0x6c] ss:$24 sps:$4 sm:$0xff]   ;;  %v914_v29 = vld [vmem:[#allocation8 + $0x68] ss:$24 sps:$4 sm:$0xff]  }
  0x3c   :  { %855 = vmatpush3.bf16.msra.mxu0 %v878_v3  ;;  %v917_v30 = vld [vmem:[#allocation8 + $0x34] ss:$24 sps:$4 sm:$0xff]   ;;  %v919_v31 = vld [vmem:[#allocation8 + $0x30] ss:$24 sps:$4 sm:$0xff]   ;;  %v923_v34 = vld [vmem:[#allocation8 + $0x4] ss:$24 sps:$4 sm:$0xff]  }
  0x3d   :  { %856 = vmatprep.subr.bf16.mxu0 %v1101_v0  ;;  %v922_v32 = vld [vmem:[#allocation8 + $0x3c] ss:$24 sps:$4 sm:$0xff]   ;;  %v920_v33 = vld [vmem:[#allocation8 + $0x38] ss:$24 sps:$4 sm:$0xff]   ;;  %v928_v36 = vld [vmem:[#allocation8 + $0xc] ss:$24 sps:$4 sm:$0xff]  }
  0x3e   :  { %497 = vmatpush1.bf16.msra.mxu1 %v895_v12  ;;  %v925_v35 = vld [vmem:[#allocation8] ss:$24 sps:$4 sm:$0xff]   ;;  %v931_v38 = vld [vmem:[#allocation8 + $0x164] ss:$24 sps:$4 sm:$0xff]   ;;  %v786_v41 = vld [vmem:[%s1247_s3] ss:$0 sm:$0xff] }
  0x3f   :  { %498 = vmatprep.subr.bf16.mxu1 %v899_v13  ;;  %v926_v37 = vld [vmem:[#allocation8 + $0x8] ss:$24 sps:$4 sm:$0xff]   ;;  %v934_v49 = vld [vmem:[#allocation8 + $0x134] ss:$24 sps:$4 sm:$0xff]   ;;  %v937_v51 = vld [vmem:[#allocation8 + $0x104] ss:$24 sps:$4 sm:$0xff]  }
  0x40   :  { %857 = vmatpush3.bf16.msra.mxu0 %v879_v8  ;;  %v929_v47 = vld [vmem:[#allocation8 + $0x160] ss:$24 sps:$4 sm:$0xff]   ;;  %v932_v50 = vld [vmem:[#allocation8 + $0x130] ss:$24 sps:$4 sm:$0xff]   ;;  %v940_v53 = vld [vmem:[#allocation8 + $0xd4] ss:$24 sps:$4 sm:$0xff]  }
  0x41   :  { %535 = vmatprep.subr.bf16.mxu0 %v886_v9  ;;  %v935_v52 = vld [vmem:[#allocation8 + $0x100] ss:$24 sps:$4 sm:$0xff]   ;;  %v938_v54 = vld [vmem:[#allocation8 + $0xd0] ss:$24 sps:$4 sm:$0xff]   ;;  %v943_v55 = vld [vmem:[#allocation8 + $0xa4] ss:$24 sps:$4 sm:$0xff]  }
  0x42   :  { %499 = vmatpush1.bf16.msra.mxu1 %v901_v16  ;;  %v941_v56 = vld [vmem:[#allocation8 + $0xa0] ss:$24 sps:$4 sm:$0xff]   ;;  %v946_v57 = vld [vmem:[#allocation8 + $0x74] ss:$24 sps:$4 sm:$0xff]   ;;  %v944_v58 = vld [vmem:[#allocation8 + $0x70] ss:$24 sps:$4 sm:$0xff]  }
  0x43   :  { %859 = vmatmul.mubr.msk.bf16.vlgmr.msra.gmra.mxu0 %vm126_vm1, %v880_v11  ;;  %500 = vmatprep.subr.bf16.mxu1 %v905_v17  ;;  %v949_v59 = vld [vmem:[#allocation8 + $0x44] ss:$24 sps:$4 sm:$0xff]   ;;  %v947_v60 = vld [vmem:[#allocation8 + $0x40] ss:$24 sps:$4 sm:$0xff]   ;;  %v952_v61 = vld [vmem:[#allocation8 + $0x14] ss:$24 sps:$4 sm:$0xff]  }
  0x44   :  { %536 = vmatpush1.bf16.msra.mxu0 %v884_v14  ;;  %567 = vmatprep.mubr.bf16.mxu0 %v1103_v39  ;;  %v950_v62 = vld [vmem:[#allocation8 + $0x10] ss:$24 sps:$4 sm:$0xff]   ;;  %v1157_v0 = vshrl.u32 %v222_v63, 7 }
  0x45   :  { %537 = vmatprep.subr.bf16.mxu0 %v892_v15  ;;  %v1164_v3 = vld [vmem:[%s1249_s5] sm:$0x3f]  ;;  %s1104_s5 = smov [#allocation10]  }
  0x46   :  { %501 = vmatpush1.bf16.msra.mxu1 %v907_v21  ;;  %v224_v1 = vsub.s32 0, %v1157_v0  ;;  %v232_v2 = vsub.s32 2, %v1157_v0  ;;  %v228_v4 = vsub.s32 1, %v1157_v0  ;;  %v236_v5 = vsub.s32 3, %v1157_v0  ;;  %s772_s20 = sshll.u32 %s1104_s5, 4  ;;  %s773_s20 = int_to_ptr.vmem [resolvable:$true] %s772_s20 }
  0x47   :  { %502 = vmatprep.subr.bf16.mxu1 %v911_v23  ;;  %s1065_s21 = scalar_lea.vmem %s773_s20, 1280  ;;  %p1070_p7 = scmp.lt.s32.totalorder %s773_s20, %s773_s20 }
  0x48   :  { %538 = vmatpush1.bf16.msra.mxu0 %v890_v18  ;;  %v225_v6 = vrot.slane %v1164_v3, %v224_v1  ;;  %v233_v7 = vrot.slane %v1164_v3, %v232_v2  ;;  %v229_v8 = vrot.slane %v1164_v3, %v228_v4  ;;  %v237_v11 = vrot.slane %v1164_v3, %v236_v5  ;;  %p1066_p6 = scmp.ne.s32.totalorder %s773_s20, %s1065_s21  ;;  %p1071_p8 = scmp.lt.s32.totalorder %s1065_s21, %s1065_s21 }
  0x49   :  { %539 = vmatprep.subr.bf16.mxu0 %v898_v19 }
  0x4a   :  { %503 = vmatpush1.bf16.msra.mxu1 %v913_v24  ;;  %p1072_p9 = por %p1071_p8, %p1070_p7 }
  0x4b   :  { %504 = vmatprep.subr.bf16.mxu1 %v917_v30 }
  0x4c   :  { %540 = vmatpush1.bf16.msra.mxu0 %v896_v20  ;;  %p1073_p10 = pnand %p1072_p9, %p1066_p6 }
  0x4d   :  { %541 = vmatprep.subr.bf16.mxu0 %v904_v22 }
  0x4e   :  { %505 = vmatpush1.bf16.msra.mxu1 %v919_v31 }
  0x4f   :  { %506 = vmatprep.subr.bf16.mxu1 %v923_v34 }
  0x50   :  { %542 = vmatpush1.bf16.msra.mxu0 %v902_v25 }
  0x51   :  { %543 = vmatprep.subr.bf16.mxu0 %v910_v26 }
  0x52   :  { %507 = vmatpush1.bf16.msra.mxu1 %v925_v35 }
  0x53   :  { %578 = vmatprep.subr.bf16.mxu1 %v931_v38 }
  0x54   :  { %544 = vmatpush1.bf16.msra.mxu0 %v908_v27 }
  0x55   :  { %545 = vmatprep.subr.bf16.mxu0 %v916_v28 }
  0x58   :  { %546 = vmatpush1.bf16.msra.mxu0 %v914_v29 }
  0x59   :  { %547 = vmatprep.subr.bf16.mxu0 %v922_v32 }
  0x5c   :  { %548 = vmatpush1.bf16.msra.mxu0 %v920_v33 }
  0x5d   :  { %549 = vmatprep.subr.bf16.mxu0 %v928_v36 }
  0x60   :  { %550 = vmatpush1.bf16.msra.mxu0 %v926_v37 }
 0x103   :  { %v164_v40 = vpop.f32.mrf.mxu0 }
 0x104   :  { %v165_v44 = vadd.f32 %v786_v41, %v164_v40 }
 0x105   :  { %v860_v42 = vpop.f32.mrf.mxu0 }
 0x107   :  { %v167_v43 = vpop.f32.mrf.mxu0 }
 0x108   :  { %v168_v45 = vadd.f32 %v786_v41, %v167_v43 }
 0x109   :  { %v861_v46 = vpop.f32.mrf.mxu0 }
 0x10a   :  { %v171_v48 = vpack.c.bf16 %v168_v45, %v165_v44  ;;  %v244_v44 = vsub.s32 5, %v1157_v0 }
 0x10c   :  { %525 = vmatmul.mubr.bf16.vlgmr.msra.gmra.mxu1 %v171_v48  ;;  %568 = vmatmul.mubr.bf16.vlgmr.msra.gmra.mxu0 %v171_v48 }
 0x10d   :  { %579 = vmatpush1.bf16.msra.mxu1 %v929_v47  ;;  %610 = vmatprep.mubr.bf16.mxu1 %v1103_v39 }
 0x10e   :  { %580 = vmatprep.subr.bf16.mxu1 %v934_v49 }
 0x111   :  { %581 = vmatpush1.bf16.msra.mxu1 %v932_v50 }
 0x112   :  { %582 = vmatprep.subr.bf16.mxu1 %v937_v51 }
 0x115   :  { %583 = vmatpush1.bf16.msra.mxu1 %v935_v52 }
 0x116   :  { %584 = vmatprep.subr.bf16.mxu1 %v940_v53 }
 0x119   :  { %585 = vmatpush1.bf16.msra.mxu1 %v938_v54 }
 0x11a   :  { %586 = vmatprep.subr.bf16.mxu1 %v943_v55 }
 0x11d   :  { %587 = vmatpush1.bf16.msra.mxu1 %v941_v56 }
 0x11e   :  { %588 = vmatprep.subr.bf16.mxu1 %v946_v57 }
 0x121   :  { %589 = vmatpush1.bf16.msra.mxu1 %v944_v58 }
 0x122   :  { %590 = vmatprep.subr.bf16.mxu1 %v949_v59 }
 0x125   :  { %591 = vmatpush1.bf16.msra.mxu1 %v947_v60 }
 0x126   :  { %592 = vmatprep.subr.bf16.mxu1 %v952_v61 }
 0x129   :  { %593 = vmatpush1.bf16.msra.mxu1 %v950_v62 }
 0x12c   :  { %611 = vmatmul.mubr.bf16.vlgmr.msra.gmra.mxu1 %v171_v48  ;;  %v245_v48 = vrot.slane %v1164_v3, %v244_v44 }
 0x1cc   :  { %v526_v9 = vpop.f32.mrf.mxu1  ;;  %v569_v10 = vpop.f32.mrf.mxu0 }
 0x1cd   :  { %v1172_v12 = vadd.f32 %v526_v9, %v225_v6  ;;  %v1174_v13 = vadd.f32 %v569_v10, %v233_v7 }
 0x1ce   :  { %v528_v14 = vpop.f32.mrf.mxu1  ;;  %v571_v15 = vpop.f32.mrf.mxu0 }
 0x1cf   :  { %v645_v16 = vand.u32 2147483647, %v1174_v13  ;;  %v529_v17 = vadd.f32 %v528_v14, %v229_v8  ;;  %621 = vmax.xlane.f32.xlu0 %v1172_v12  ;;  %v1178_v18 = vadd.f32 %v571_v15, %v237_v11  ;;  %v639_v61 = vmax.f32 %v1174_v13, 0.0 }
 0x1d0   :  { %v530_v19 = vpop.f32.mrf.mxu1  ;;  %v573_v20 = vpop.f32.mrf.mxu0  ;;  %vm641_vm2 = vcmp.ne.f32.partialorder %v1174_v13, %v1174_v13 }
 0x1d1   :  { %v647_v21 = vsub.f32 0.0, %v645_v16  ;;  %759 = vst [vmem:[#allocation10 + $0x8] sm:$0xff] %v529_v17  ;;  %v1180_v22 = vadd.f32 %v530_v19, %v225_v6  ;;  %v1182_v23 = vadd.f32 %v573_v20, %v233_v7  ;;  %v681_v24 = vand.u32 2147483647, %v1178_v18 }
 0x1d2   :  { %v532_v25 = vpop.f32.mrf.mxu1  ;;  %v575_v26 = vpop.f32.mrf.mxu0  ;;  %v675_v7 = vmax.f32 %v1178_v18, 0.0  ;;  %vm677_vm6 = vcmp.ne.f32.partialorder %v1178_v18, %v1178_v18 }
 0x1d3   :  { %v649_v27 = vmul.f32 1.442695, %v647_v21  ;;  %v646_v28 = vand.u32 2147483647, %v1182_v23  ;;  %623 = vmax.xlane.f32.xlu0 %v1180_v22  ;;  %v683_v29 = vsub.f32 0.0, %v681_v24  ;;  %v533_v30 = vadd.f32 %v532_v25, %v229_v8 }
 0x1d4   :  { %v1187_v31 = vadd.f32 %v575_v26, %v237_v11  ;;  %v640_v8 = vmax.f32 %v1182_v23, 0.0  ;;  %vm642_vm7 = vcmp.ne.f32.partialorder %v1182_v23, %v1182_v23 }
 0x1d5   :  { %953 = vpow2.f32 %v649_v27  ;;  %v648_v32 = vsub.f32 0.0, %v646_v28  ;;  %v685_v33 = vmul.f32 1.442695, %v683_v29  ;;  %760 = vst [vmem:[#allocation10 + $0x30] sm:$0xff] %v533_v30 }
 0x1d6   :  { %v682_v34 = vand.u32 2147483647, %v1187_v31  ;;  %vm678_vm9 = vcmp.ne.f32.partialorder %v1187_v31, %v1187_v31 }
 0x1d7   :  { %v651_v35 = vmul.f32 1.442695, %v648_v32  ;;  %955 = vpow2.f32 %v685_v33 }
 0x1d8   :  { %v684_v36 = vsub.f32 0.0, %v682_v34 }
 0x1d9   :  { %957 = vpow2.f32 %v651_v35 }
 0x1da   :  { %v687_v37 = vmul.f32 1.442695, %v684_v36 }
 0x1dc   :  { %959 = vpow2.f32 %v687_v37 }
 0x1e2   :  { %v954_v38 = vpop.eup %953 }
 0x1e3   :  { %v653_v39 = vadd.f32 1.0, %v954_v38  ;;  %v656_v46 = vmul.f32 -0.5, %v954_v38  ;;  %v659_v55 = vand.u32 2147483647, %v954_v38 }
 0x1e4   :  { %v956_v40 = vpop.eup %955 }
 0x1e5   :  { %961 = vlog2.f32 %v653_v39  ;;  %v689_v42 = vadd.f32 1.0, %v956_v40  ;;  %v692_v50 = vmul.f32 -0.5, %v956_v40  ;;  %v657_v51 = vadd.f32 1.0, %v656_v46 }
 0x1e6   :  { %v958_v41 = vpop.eup %957  ;;  %v695_v58 = vand.u32 2147483647, %v956_v40  ;;  %vm660_vm3 = vcmp.lt.f32.partialorder %v659_v55, 0.0004427343 }
 0x1e7   :  { %v662_v43 = vadd.f32 1.0, %v958_v41  ;;  %963 = vlog2.f32 %v689_v42  ;;  %v665_v53 = vmul.f32 -0.5, %v958_v41  ;;  %v693_v57 = vadd.f32 1.0, %v692_v50 }
 0x1e8   :  { %v658_v62 = vmul.f32 %v954_v38, %v657_v51  ;;  %v668_v9 = vand.u32 2147483647, %v958_v41  ;;  %vm1206_vm4 = vcmp.lt.f32.partialorder %v695_v58, 0.0004427343 }
 0x1e9   :  { %v960_v45 = vpop.eup %959  ;;  %965 = vlog2.f32 %v662_v43  ;;  %v666_v4 = vadd.f32 1.0, %v665_v53  ;;  %v694_v14 = vmul.f32 %v956_v40, %v693_v57  ;;  %v240_v53 = vsub.s32 4, %v1157_v0  ;;  %v842_v57 = vld [vmem:[#allocation5] sm:$0xff]  }
 0x1ea   :  { %v698_v47 = vadd.f32 1.0, %v960_v45  ;;  %v701_v63 = vmul.f32 -0.5, %v960_v45  ;;  %v704_v27 = vand.u32 2147483647, %v960_v45  ;;  %vm669_vm5 = vcmp.lt.f32.partialorder %v668_v9, 0.0004427343 }
 0x1eb   :  { %v667_v26 = vmul.f32 %v958_v41, %v666_v4 }
 0x1ec   :  { %967 = vlog2.f32 %v698_v47  ;;  %v1192_v49 = vpop.f32.mrf.mxu1  ;;  %v702_v21 = vadd.f32 1.0, %v701_v63  ;;  %vm705_vm8 = vcmp.lt.f32.partialorder %v704_v27, 0.0004427343  ;;  %v843_v63 = vunpack.c.l.bf16 %v842_v57 }
 0x1ee   :  { %v614_v52 = vpop.f32.mrf.mxu1  ;;  %v703_v37 = vmul.f32 %v960_v45, %v702_v21 }
 0x1ef   :  { %v1194_v54 = vadd.f32 %v614_v52, %v245_v48 }
 0x1f0   :  { %v1196_v56 = vpop.f32.mrf.mxu1 }
 0x1f1   :  { %v719_v59 = vand.u32 2147483647, %v1194_v54  ;;  %vm715_vm11 = vcmp.ne.f32.partialorder %v1194_v54, %v1194_v54 }
 0x1f2   :  { %v962_v60 = vpop.eup %961  ;;  %v618_v1 = vpop.f32.mrf.mxu1 }
 0x1f3   :  { %v655_v2 = vmul.f32 0.6931472, %v962_v60  ;;  %v721_v5 = vsub.f32 0.0, %v719_v59  ;;  %v1202_v6 = vadd.f32 %v618_v1, %v245_v48 }
 0x1f4   :  { %v964_v10 = vpop.eup %963 }
 0x1f5   :  { %v661_v11 = vsel %vm660_vm3, %v658_v62, %v655_v2  ;;  %v723_v16 = vmul.f32 1.442695, %v721_v5  ;;  %v691_v20 = vmul.f32 0.6931472, %v964_v10  ;;  %v720_v24 = vand.u32 2147483647, %v1202_v6 }
 0x1f6   :  { %v966_v17 = vpop.eup %965  ;;  %v671_v19 = vadd.f32 %v661_v11, %v639_v61  ;;  %v241_v61 = vrot.slane %v1164_v3, %v240_v53  ;;  %v714_v10 = vmax.f32 %v1202_v6, 0.0  ;;  %v844_v3 = vunpack.c.h.bf16 %v842_v57 }
 0x1f7   :  { %v664_v25 = vmul.f32 0.6931472, %v966_v17  ;;  %969 = vpow2.f32 %v723_v16  ;;  %v697_v29 = vsel %vm1206_vm4, %v694_v14, %v691_v20  ;;  %v722_v30 = vsub.f32 0.0, %v720_v24 }
 0x1f8   :  { %v673_v28 = vsel %vm641_vm2, %v1174_v13, %v671_v19  ;;  %v707_v33 = vadd.f32 %v697_v29, %v675_v7  ;;  %v676_v13 = vmax.f32 %v1187_v31, 0.0  ;;  %vm716_vm13 = vcmp.ne.f32.partialorder %v1202_v6, %v1202_v6 }
 0x1f9   :  { %v968_v32 = vpop.eup %967  ;;  %761 = vst [vmem:[#allocation10 + $0x10] sm:$0xff] %v673_v28  ;;  %v670_v34 = vsel %vm669_vm5, %v667_v26, %v664_v25  ;;  %v725_v38 = vmul.f32 1.442695, %v722_v30 }
 0x1fa   :  { %v672_v35 = vadd.f32 %v670_v34, %v640_v8  ;;  %v700_v36 = vmul.f32 0.6931472, %v968_v32  ;;  %v709_v39 = vsel %vm677_vm6, %v1178_v18, %v707_v33  ;;  %v613_v8 = vadd.f32 %v1192_v49, %v241_v61 }
 0x1fb   :  { %v711_v40 = vadd.f32 2.0, %v709_v39  ;;  %971 = vpow2.f32 %v725_v38 }
 0x1fc   :  { %v674_v41 = vsel %vm642_vm7, %v1182_v23, %v672_v35  ;;  %v706_v42 = vsel %vm705_vm8, %v703_v37, %v700_v36 }
 0x1fd   :  { %762 = vst [vmem:[#allocation10 + $0x38] sm:$0xff] %v674_v41  ;;  %v708_v43 = vadd.f32 %v706_v42, %v676_v13  ;;  %763 = vst [vmem:[#allocation10 + $0x18] sm:$0xff] %v711_v40 }
 0x1ff   :  { %v710_v44 = vsel %vm678_vm9, %v1187_v31, %v708_v43  ;;  %v713_v31 = vmax.f32 %v1194_v54, 0.0 }
 0x200   :  { %v712_v18 = vadd.f32 2.0, %v710_v44 }
 0x202   :  { %764 = vst [vmem:[#allocation10 + $0x40] sm:$0xff] %v712_v18 }
 0x204   :  { %v970_v45 = vpop.eup %969 }
 0x205   :  { %v727_v46 = vadd.f32 1.0, %v970_v45  ;;  %v730_v50 = vmul.f32 -0.5, %v970_v45  ;;  %v733_v51 = vand.u32 2147483647, %v970_v45 }
 0x207   :  { %973 = vlog2.f32 %v727_v46  ;;  %v731_v23 = vadd.f32 1.0, %v730_v50  ;;  %vm734_vm10 = vcmp.lt.f32.partialorder %v733_v51, 0.0004427343 }
 0x208   :  { %v972_v47 = vpop.eup %971 }
 0x209   :  { %v736_v48 = vadd.f32 1.0, %v972_v47  ;;  %v739_v52 = vmul.f32 -0.5, %v972_v47  ;;  %v732_v59 = vmul.f32 %v970_v45, %v731_v23  ;;  %v742_v1 = vand.u32 2147483647, %v972_v47 }
 0x20b   :  { %975 = vlog2.f32 %v736_v48  ;;  %v740_v60 = vadd.f32 1.0, %v739_v52  ;;  %vm743_vm12 = vcmp.lt.f32.partialorder %v742_v1, 0.0004427343 }
 0x20d   :  { %v741_v7 = vmul.f32 %v972_v47, %v740_v60 }
 0x214   :  { %v974_v55 = vpop.eup %973 }
 0x215   :  { %v729_v58 = vmul.f32 0.6931472, %v974_v55 }
 0x217   :  { %v735_v62 = vsel %vm734_vm10, %v732_v59, %v729_v58 }
 0x218   :  { %v745_v2 = vadd.f32 %v735_v62, %v713_v31  ;;  %v976_v4 = vpop.eup %975 }
 0x219   :  { %v738_v5 = vmul.f32 0.6931472, %v976_v4 }
 0x21a   :  { %v747_v0 = vsel %vm715_vm11, %v1194_v54, %v745_v2  ;;  %v617_v54 = vadd.f32 %v1196_v56, %v241_v61 }
 0x21b   :  { %v753_v9 = vmul.f32 %v843_v63, %v747_v0  ;;  %v744_v11 = vsel %vm743_vm12, %v741_v7, %v738_v5 }
 0x21c   :  { %v746_v15 = vadd.f32 %v744_v11, %v714_v10 }
 0x21d   :  { %v755_v14 = vadd.f32 %v753_v9, %v613_v8 }
 0x21e   :  { %v748_v16 = vsel %vm716_vm13, %v1202_v6, %v746_v15 }
 0x21f   :  { %765 = vst [vmem:[#allocation10 + $0x20] sm:$0xff] %v755_v14  ;;  %v754_v17 = vmul.f32 %v844_v3, %v748_v16 }
 0x221   :  { %v756_v19 = vadd.f32 %v754_v17, %v617_v54 }
 0x223   :  { %766 = vst [vmem:[#allocation10 + $0x48] sm:$0xff] %v756_v19 }
 0x258   :  { %v622_v49 = vpop.xlane.xlu0 %621 }
 0x259   :  { %v625_v20 = vsub.f32 %v1172_v12, %v622_v49 }
 0x25b   :  { %v627_v21 = vmul.f32 1.442695, %v625_v20 }
 0x25c   :  { %v624_v24 = vpop.xlane.xlu0 %623 }
 0x25d   :  { %977 = vpow2.f32 %v627_v21  ;;  %v626_v25 = vsub.f32 %v1180_v22, %v624_v24 }
 0x25f   :  { %v629_v26 = vmul.f32 1.442695, %v626_v25 }
 0x261   :  { %979 = vpow2.f32 %v629_v26 }
 0x26a   :  { %v978_v27 = vpop.eup %977 }
 0x26b   :  { %631 = vadd.xlane.f32.xlu1 %v978_v27 }
 0x26e   :  { %v980_v28 = vpop.eup %979 }
 0x26f   :  { %633 = vadd.xlane.f32.xlu1 %v980_v28 }
 0x2f4   :  { %v632_v6 = vpop.xlane.xlu1 %631 }
 0x2f5   :  { %981 = vrcp.f32 %v632_v6 }
 0x2f8   :  { %v634_v56 = vpop.xlane.xlu1 %633 }
 0x2f9   :  { %983 = vrcp.f32 %v634_v56 }
 0x302   :  { %v982_v29 = vpop.eup %981 }
 0x303   :  { %v636_v30 = vmul.f32 %v982_v29, %v978_v27 }
 0x305   :  { %757 = vst [vmem:[#allocation10] sm:$0xff] %v636_v30 }
 0x306   :  { %v984_v12 = vpop.eup %983 }
 0x307   :  { %v638_v32 = vmul.f32 %v984_v12, %v980_v28 }
 0x309   :  { %758 = vst [vmem:[#allocation10 + $0x28] sm:$0xff] %v638_v32 }
 0x30a   :  { %1076 = shalt.err (!%p1073_p10)
}
 0x30b   :  { %s1105_s22 = smov 640   ;;  %s1106_s23 = smov 40  }
 0x30c   :  { %778 = dma.vmem_to_hbm [thread:$0]  %s773_s20, 1280, %s1250_s6, [#allocation4], %s1105_s22, %s1105_s22, %s1106_s23  }
 0x30d   :  { %1091 = dma.done.wait [#allocation4], 1280  }
 0x30e   :  { %1092 = vsyncadd [#allocation4], 4294966016 }
 0x30f   :  { %782 = vsyncpa [#allocation3], 1 }
 0x310   :  { %783 = vsyncpa [#allocation6], 1 }
 0x311   :  { %784 = vsyncpa [#allocation9], 1 }
 0x312   :  { %785 = vsyncpa [#allocation4], 1 }

</bundles_post_ra>
